<compile_context>
chip_gen: v5e
topology: v5e:2x2
jax: 0.10.0
libtpu: 0.0.40
codegen_flags: <defaults>
</compile_context>

<pallas_src>
import jax
import jax.numpy as jnp
from jax.experimental import pallas as pl
from jax.experimental.pallas import tpu as pltpu

D_IN = 28 * 28   # 784
H1 = 500         # logical fc1 width (nn.Linear(784, 500))
H1P = 512        # zero-padded to a multiple of 128 lanes
H2 = 256
D_OUT = 10


def _round_up(x, m):
    return ((x + m - 1) // m) * m


def mlp_kernel(x_ref, w1_ref, b1_ref, w2_ref, b2_ref, w3_ref, b3_ref, o_ref):
    # f32 -> bf16 cast folded into the kernel (VPU filler under the MXU); this
    # replaces the wrapper-side astype that cost an extra HBM pass over x.
    x = x_ref[...].astype(jnp.bfloat16)

    # fc1: bf16 x bf16 -> f32 MXU accumulation; bias-add + ReLU in bf16.
    # Padded lanes 500..511 have b1 == 0 and zero w2 rows -> contribute nothing.
    h1 = jnp.dot(x, w1_ref[...], preferred_element_type=jnp.float32)
    h1 = jnp.maximum(h1.astype(jnp.bfloat16) + b1_ref[...], 0.0)

    # fc2: same pattern.
    h2 = jnp.dot(h1, w2_ref[...], preferred_element_type=jnp.float32)
    h2 = jnp.maximum(h2.astype(jnp.bfloat16) + b2_ref[...], 0.0)

    # fc3 + softmax over dim 1, in f32.  Exact divide (NOT approx reciprocal)
    # so rows sum to 1 to f32 precision.
    logits = jnp.dot(h2, w3_ref[...], preferred_element_type=jnp.float32)
    logits = logits + b3_ref[...]
    m = jnp.max(logits, axis=1, keepdims=True)
    e = jnp.exp(logits - m)
    denom = jnp.sum(e, axis=1, keepdims=True)
    o_ref[...] = e / denom


def neural_net_forward(x, prepared_params, *, batch_tile=1024):
    """x: (B, 1, 28, 28) (or anything flattening to (-1, 784)), float dtype.
    prepared_params: output of prepare_params().
    batch_tile: rows per grid step (multiple of 8); sweepable 512..2048."""
    w1, b1, w2, b2, w3, b3 = prepared_params
    x2d = x.reshape(-1, D_IN)
    B = x2d.shape[0]

    # Pad the batch to a sublane multiple (8) so tiny batches form legal tiles.
    # Padded rows are zeros; everything is row-wise and they are sliced off.
    Bp = _round_up(B, 8)
    if Bp != B:
        x2d = jnp.pad(x2d, ((0, Bp - B), (0, 0)))

    TB = min(_round_up(batch_tile, 8), Bp)
    if Bp >= 16:
        # Keep at least 2 grid steps: the "parallel" batch axis shards across
        # the two TensorCores on v7x; grid=(1,) would idle one TC there.
        TB = min(TB, _round_up(pl.cdiv(Bp, 2), 8))
    grid = (pl.cdiv(Bp, TB),)
    # NOTE: when Bp is not a multiple of TB the trailing partial tile computes
    # on stale VMEM rows; all ops are row-wise and the partial output store
    # drops those rows, so this is benign (do not "fix" by reducing over rows).

    # Weights/biases keep a constant block index -> fetched once and kept
    # VMEM-resident across grid steps; only x / out revolve with the batch.
    const = lambda shape: pl.BlockSpec(shape, lambda i: (0,) * len(shape))

    out = pl.pallas_call(
        mlp_kernel,
        out_shape=jax.ShapeDtypeStruct((Bp, D_OUT), jnp.float32),
        grid=grid,
        in_specs=[
            pl.BlockSpec((TB, D_IN), lambda i: (i, 0)),
            const((D_IN, H1P)), const((1, H1P)),
            const((H1P, H2)), const((1, H2)),
            const((H2, D_OUT)), const((1, D_OUT)),
        ],
        out_specs=pl.BlockSpec((TB, D_OUT), lambda i: (i, 0)),
        compiler_params=pltpu.CompilerParams(
            # Batch axis is independent -> megacore sharding on v7x; harmless
            # no-op on v5e/v6e.
            dimension_semantics=("parallel",),
            # 32 MiB scoped VMEM: matches v6e/v7x defaults, raises v5e's 16 MiB
            # default so the larger batch tile compiles without spills.
            vmem_limit_bytes=32 * 1024 * 1024,
        ),
    )(x2d, w1, b1, w2, b2, w3, b3)
    return out[:B]


def init_params(key):
    """Deterministic f32 init matching nn.Linear shapes, stored as (in, out)."""
    ks = jax.random.split(key, 6)

    def linear(kw, kb, fan_in, fan_out):
        bound = 1.0 / jnp.sqrt(fan_in)
        w = jax.random.uniform(kw, (fan_in, fan_out), jnp.float32, -bound, bound)
        b = jax.random.uniform(kb, (1, fan_out), jnp.float32, -bound, bound)
        return w, b

    w1, b1 = linear(ks[0], ks[1], D_IN, H1)
    w2, b2 = linear(ks[2], ks[3], H1, H2)
    w3, b3 = linear(ks[4], ks[5], H2, D_OUT)
    return (w1, b1, w2, b2, w3, b3)


def prepare_params(params):
    """Pad H1 500->512 and cast to kernel dtypes.
    Weights -> bf16; b1/b2 -> bf16 (bias-add + ReLU run in bf16); b3 stays f32
    (final bias-add + softmax are f32).  Padded b1 lanes are 0 and padded w2
    rows are 0, so the extra lanes stay 0 through ReLU and contribute nothing."""
    w1, b1, w2, b2, w3, b3 = params
    pad = H1P - H1
    w1p = jnp.pad(w1, ((0, 0), (0, pad)))
    b1p = jnp.pad(b1, ((0, 0), (0, pad)))
    w2p = jnp.pad(w2, ((0, pad), (0, 0)))
    return (w1p.astype(jnp.bfloat16), b1p.astype(jnp.bfloat16),
            w2p.astype(jnp.bfloat16), b2.astype(jnp.bfloat16),
            w3.astype(jnp.bfloat16), b3)


if __name__ == "__main__":
    key = jax.random.PRNGKey(0)
    kx, kp = jax.random.split(key)
    # Small MNIST-like batch, NCHW like the PyTorch module: (B=2, 1, 28, 28).
    x = jax.random.normal(kx, (2, 1, 28, 28), jnp.float32)
    params = init_params(kp)
    prepared = prepare_params(params)

    out = neural_net_forward(x, prepared)
    out = jax.block_until_ready(out)

    assert out.shape == (2, 10)
    # softmax rows sum to 1 (exact divide in the kernel)
    assert bool(jnp.allclose(jnp.sum(out, axis=1), 1.0, atol=1e-3))

    # reference 1: same bf16/padded arithmetic as the kernel (tight check)
    w1, b1, w2, b2, w3, b3 = prepared
    x2d = x.reshape(-1, D_IN).astype(jnp.bfloat16)
    h = jnp.dot(x2d, w1, preferred_element_type=jnp.float32)
    h = jnp.maximum(h.astype(jnp.bfloat16) + b1, 0.0)
    h = jnp.dot(h, w2, preferred_element_type=jnp.float32)
    h = jnp.maximum(h.astype(jnp.bfloat16) + b2, 0.0)
    logits = jnp.dot(h, w3, preferred_element_type=jnp.float32) + b3
    ref_bf16 = jax.nn.softmax(logits, axis=1)
    assert bool(jnp.allclose(out, ref_bf16, atol=5e-3, rtol=5e-3))

    # reference 2: original full-f32 module semantics (loose check covering
    # the bf16 weight quantization)
    fw1, fb1, fw2, fb2, fw3, fb3 = params
    xf = x.reshape(-1, D_IN)
    hf = jnp.maximum(xf @ fw1 + fb1, 0.0)
    hf = jnp.maximum(hf @ fw2 + fb2, 0.0)
    ref_f32 = jax.nn.softmax(hf @ fw3 + fb3, axis=1)
    assert bool(jnp.allclose(out, ref_f32, atol=5e-2))

    print("KERNEL_OK")
</pallas_src>

<mosaic_0001>
module attributes {stable_mosaic.version = 11 : i64} {
  func.func @mlp_kernel(%arg0: i32, %arg1: memref<8x784xf32, #tpu.memory_space<vmem>>, %arg2: memref<784x512xbf16, #tpu.memory_space<vmem>>, %arg3: memref<1x512xbf16, #tpu.memory_space<vmem>>, %arg4: memref<512x256xbf16, #tpu.memory_space<vmem>>, %arg5: memref<1x256xbf16, #tpu.memory_space<vmem>>, %arg6: memref<256x10xbf16, #tpu.memory_space<vmem>>, %arg7: memref<1x10xf32, #tpu.memory_space<vmem>>, %arg8: memref<8x10xf32, #tpu.memory_space<vmem>>) attributes {dimension_semantics = [#tpu.dimension_semantics<parallel>], iteration_bounds = array<i64: 1>, scalar_prefetch = 0 : i64, scratch_operands = 0 : i64, tpu.core_type = #tpu.core_type<tc>, window_params = [{transform_indices = @transform_0, window_bounds = array<i64: 8, 784>}, {pipeline_mode = #tpu.pipeline_mode<synchronous>, transform_indices = @transform_1, window_bounds = array<i64: 784, 512>}, {pipeline_mode = #tpu.pipeline_mode<synchronous>, transform_indices = @transform_2, window_bounds = array<i64: 1, 512>}, {pipeline_mode = #tpu.pipeline_mode<synchronous>, transform_indices = @transform_3, window_bounds = array<i64: 512, 256>}, {pipeline_mode = #tpu.pipeline_mode<synchronous>, transform_indices = @transform_4, window_bounds = array<i64: 1, 256>}, {pipeline_mode = #tpu.pipeline_mode<synchronous>, transform_indices = @transform_5, window_bounds = array<i64: 256, 10>}, {pipeline_mode = #tpu.pipeline_mode<synchronous>, transform_indices = @transform_6, window_bounds = array<i64: 1, 10>}, {transform_indices = @transform_7, window_bounds = array<i64: 8, 10>}]} {
    %c0 = arith.constant 0 : index
    %c0_0 = arith.constant 0 : index
    %0 = vector.load %arg1[%c0, %c0_0] : memref<8x784xf32, #tpu.memory_space<vmem>>, vector<8x784xf32>
    %1 = arith.truncf %0 : vector<8x784xf32> to vector<8x784xbf16>
    %c0_1 = arith.constant 0 : index
    %c0_2 = arith.constant 0 : index
    %2 = vector.load %arg2[%c0_1, %c0_2] : memref<784x512xbf16, #tpu.memory_space<vmem>>, vector<784x512xbf16>
    %cst = arith.constant dense<0.000000e+00> : vector<8x512xf32>
    %3 = tpu.matmul %1, %2, %cst {dimension_numbers = #tpu.dot_dimension_numbers<[1], [0], [0], [1], [0, 0, 1, 1], [], []>} : vector<8x784xbf16>, vector<784x512xbf16>, vector<8x512xf32> -> vector<8x512xf32>
    %4 = arith.truncf %3 : vector<8x512xf32> to vector<8x512xbf16>
    %c0_3 = arith.constant 0 : index
    %c0_4 = arith.constant 0 : index
    %5 = vector.load %arg3[%c0_3, %c0_4] : memref<1x512xbf16, #tpu.memory_space<vmem>>, vector<1x512xbf16>
    %6 = vector.broadcast %5 : vector<1x512xbf16> to vector<8x512xbf16>
    %7 = arith.addf %4, %6 : vector<8x512xbf16>
    %cst_5 = arith.constant 0.000000e+00 : bf16
    %8 = vector.broadcast %cst_5 : bf16 to vector<8x512xbf16>
    %9 = arith.maximumf %7, %8 : vector<8x512xbf16>
    %c0_6 = arith.constant 0 : index
    %c0_7 = arith.constant 0 : index
    %10 = vector.load %arg4[%c0_6, %c0_7] : memref<512x256xbf16, #tpu.memory_space<vmem>>, vector<512x256xbf16>
    %cst_8 = arith.constant dense<0.000000e+00> : vector<8x256xf32>
    %11 = tpu.matmul %9, %10, %cst_8 {dimension_numbers = #tpu.dot_dimension_numbers<[1], [0], [0], [1], [0, 0, 1, 1], [], []>} : vector<8x512xbf16>, vector<512x256xbf16>, vector<8x256xf32> -> vector<8x256xf32>
    %12 = arith.truncf %11 : vector<8x256xf32> to vector<8x256xbf16>
    %c0_9 = arith.constant 0 : index
    %c0_10 = arith.constant 0 : index
    %13 = vector.load %arg5[%c0_9, %c0_10] : memref<1x256xbf16, #tpu.memory_space<vmem>>, vector<1x256xbf16>
    %14 = vector.broadcast %13 : vector<1x256xbf16> to vector<8x256xbf16>
    %15 = arith.addf %12, %14 : vector<8x256xbf16>
    %cst_11 = arith.constant 0.000000e+00 : bf16
    %16 = vector.broadcast %cst_11 : bf16 to vector<8x256xbf16>
    %17 = arith.maximumf %15, %16 : vector<8x256xbf16>
    %c0_12 = arith.constant 0 : index
    %c0_13 = arith.constant 0 : index
    %18 = vector.load %arg6[%c0_12, %c0_13] : memref<256x10xbf16, #tpu.memory_space<vmem>>, vector<256x10xbf16>
    %cst_14 = arith.constant dense<0.000000e+00> : vector<8x10xf32>
    %19 = tpu.matmul %17, %18, %cst_14 {dimension_numbers = #tpu.dot_dimension_numbers<[1], [0], [0], [1], [0, 0, 1, 1], [], []>} : vector<8x256xbf16>, vector<256x10xbf16>, vector<8x10xf32> -> vector<8x10xf32>
    %c0_15 = arith.constant 0 : index
    %c0_16 = arith.constant 0 : index
    %20 = vector.load %arg7[%c0_15, %c0_16] : memref<1x10xf32, #tpu.memory_space<vmem>>, vector<1x10xf32>
    %21 = vector.broadcast %20 : vector<1x10xf32> to vector<8x10xf32>
    %22 = arith.addf %19, %21 : vector<8x10xf32>
    %cst_17 = arith.constant dense<0xFF800000> : vector<8xf32>
    %23 = vector.multi_reduction <maximumf>, %22, %cst_17 [1] : vector<8x10xf32> to vector<8xf32>
    %24 = vector.shape_cast %23 : vector<8xf32> to vector<8x1xf32>
    %25 = vector.broadcast %24 : vector<8x1xf32> to vector<8x10xf32>
    %26 = arith.subf %22, %25 : vector<8x10xf32>
    %27 = math.exp %26 : vector<8x10xf32>
    %cst_18 = arith.constant dense<0.000000e+00> : vector<8xf32>
    %28 = vector.multi_reduction <add>, %27, %cst_18 [1] : vector<8x10xf32> to vector<8xf32>
    %29 = vector.shape_cast %28 : vector<8xf32> to vector<8x1xf32>
    %30 = vector.broadcast %29 : vector<8x1xf32> to vector<8x10xf32>
    %31 = arith.divf %27, %30 : vector<8x10xf32>
    %c0_19 = arith.constant 0 : index
    %c0_20 = arith.constant 0 : index
    %32 = vector.load %arg8[%c0_19, %c0_20] : memref<8x10xf32, #tpu.memory_space<vmem>>, vector<8x10xf32>
    tpu.vector_store %arg8[%c0_19, %c0_20], %31 {strides = array<i32>} : memref<8x10xf32, #tpu.memory_space<vmem>>, vector<8x10xf32>,
    return
  }
  func.func @transform_0(%arg0: i32) -> (i32, i32) {
    %c0_i32 = arith.constant 0 : i32
    %c0_i32_0 = arith.constant 0 : i32
    return %arg0, %c0_i32 : i32, i32
  }
  func.func @transform_1(%arg0: i32) -> (i32, i32) {
    %c0_i32 = arith.constant 0 : i32
    %c0_i32_0 = arith.constant 0 : i32
    %c0_i32_1 = arith.constant 0 : i32
    return %c0_i32, %c0_i32_0 : i32, i32
  }
  func.func @transform_2(%arg0: i32) -> (i32, i32) {
    %c0_i32 = arith.constant 0 : i32
    %c0_i32_0 = arith.constant 0 : i32
    %c0_i32_1 = arith.constant 0 : i32
    return %c0_i32, %c0_i32_0 : i32, i32
  }
  func.func @transform_3(%arg0: i32) -> (i32, i32) {
    %c0_i32 = arith.constant 0 : i32
    %c0_i32_0 = arith.constant 0 : i32
    %c0_i32_1 = arith.constant 0 : i32
    return %c0_i32, %c0_i32_0 : i32, i32
  }
  func.func @transform_4(%arg0: i32) -> (i32, i32) {
    %c0_i32 = arith.constant 0 : i32
    %c0_i32_0 = arith.constant 0 : i32
    %c0_i32_1 = arith.constant 0 : i32
    return %c0_i32, %c0_i32_0 : i32, i32
  }
  func.func @transform_5(%arg0: i32) -> (i32, i32) {
    %c0_i32 = arith.constant 0 : i32
    %c0_i32_0 = arith.constant 0 : i32
    %c0_i32_1 = arith.constant 0 : i32
    return %c0_i32, %c0_i32_0 : i32, i32
  }
  func.func @transform_6(%arg0: i32) -> (i32, i32) {
    %c0_i32 = arith.constant 0 : i32
    %c0_i32_0 = arith.constant 0 : i32
    %c0_i32_1 = arith.constant 0 : i32
    return %c0_i32, %c0_i32_0 : i32, i32
  }
  func.func @transform_7(%arg0: i32) -> (i32, i32) {
    %c0_i32 = arith.constant 0 : i32
    %c0_i32_0 = arith.constant 0 : i32
    return %arg0, %c0_i32 : i32, i32
  }
}

</mosaic_0001>

<bundles_post_ra>
// kernel: tpu_custom_call.1
= control target key start
LH: loop header
LB: loop body
LE: loop exit
PB: predicated region body
PF: predicated region fallthrough
CT: control target
= control target key end

     0   :  { %12 = vsyncpa [#allocation3], 0  ;;  %s4076_s0 = inlined_call_operand.vmem [shape: f32[8,784], index: 0, kind: input, shape index: {}]   ;;  %s4077_s1 = inlined_call_operand.hbm [shape: bf16[784,512], index: 1, kind: input, shape index: {}]   ;;  %s4078_s2 = inlined_call_operand.vmem [shape: bf16[1,512], index: 2, kind: input, shape index: {}]   ;;  %s4079_s3 = inlined_call_operand.hbm [shape: bf16[512,256], index: 3, kind: input, shape index: {}]   ;;  %s4080_s4 = inlined_call_operand.vmem [shape: bf16[1,256], index: 4, kind: input, shape index: {}]   ;;  %s4081_s5 = inlined_call_operand.vmem [shape: bf16[256,10], index: 5, kind: input, shape index: {}]   ;;  %s4082_s6 = inlined_call_operand.vmem [shape: f32[1,10], index: 6, kind: input, shape index: {}]   ;;  %s4083_s7 = inlined_call_operand.hbm [shape: f32[8,10], index: 7, kind: output, shape index: {}]  }
   0x1   :  { %13 = vsyncpa [#allocation6], 0 }
   0x2   :  { %14 = vsyncpa [#allocation4], 0  ;;  %s21_s26 = sshll.u32 %s4077_s1, 4  ;;  %s3854_s27 = smov [#allocation2]   ;;  %s22_s26 = int_to_ptr.hbm [resolvable:$true] %s21_s26 }
   0x3   :  { %s23_s28 = sshll.u32 %s3854_s27, 4  ;;  %s36_s8 = sshll.u32 %s4079_s3, 4  ;;  %s24_s28 = int_to_ptr.vmem [resolvable:$true] %s23_s28  ;;  %s37_s8 = int_to_ptr.hbm [resolvable:$true] %s36_s8 }
   0x4   :  { %s3855_s9 = smov 256   ;;  %s3856_s10 = smov 16  }
   0x5   :  { %29 = dma.hbm_to_vmem [thread:$0]  %s22_s26, 25088, %s24_s28, [#allocation3], %s3855_s9, %s3855_s9, %s3856_s10  }
   0x6   :  { %s3857_s11 = smov [#allocation5]   ;;  %s3858_s13 = smov 128  }
   0x7   :  { %s38_s12 = sshll.u32 %s3857_s11, 4  ;;  %s3859_s14 = smov 8   ;;  %s39_s12 = int_to_ptr.vmem [resolvable:$true] %s38_s12 }
   0x8   :  { %44 = dma.hbm_to_vmem [thread:$0]  %s37_s8, 8192, %s39_s12, [#allocation6], %s3858_s13, %s3858_s13, %s3859_s14  }
   0x9   :  { %3848 = dma.done.wait [#allocation3], 25088  }
   0xa   :  { %3849 = vsyncadd [#allocation3], 4294942208 }
   0xb   :  { %3850 = dma.done.wait [#allocation6], 8192  }
   0xc   :  { %3851 = vsyncadd [#allocation6], 4294959104  ;;  %v2494_v0 = vld [vmem:[#allocation2 + $0xe0] sm:$0xf]  ;;  %v3518_v1 = vld [vmem:[#allocation2 + $0xec] sm:$0xf0] }
   0xd   :  { %v2622_v2 = vld [vmem:[#allocation2 + $0x1e0] sm:$0xf]  ;;  %v2495_v3 = vor.u32 %v3518_v1, %v2494_v0  ;;  %v3550_v4 = vld [vmem:[#allocation2 + $0x1ec] sm:$0xf0]  ;;  %vm1250_vm0 = vcmask 130048   ;;  %vm2336_vm1 = vcmask 80896  }
   0xe   :  { %v2750_v5 = vld [vmem:[#allocation2 + $0x2e0] sm:$0xf]  ;;  %v3582_v6 = vld [vmem:[#allocation2 + $0x2ec] sm:$0xf0]  ;;  %v2623_v7 = vor.u32 %v3550_v4, %v2622_v2  ;;  %s2369_s13 = sshll.u32 %s4083_s7, 4  ;;  %s2370_s13 = int_to_ptr.hbm [resolvable:$true] %s2369_s13 }
   0xf   :  { %v2751_v8 = vor.u32 %v3582_v6, %v2750_v5  ;;  %v2878_v9 = vld [vmem:[#allocation2 + $0x3e0] sm:$0xf]  ;;  %v3614_v10 = vld [vmem:[#allocation2 + $0x3ec] sm:$0xf0]  ;;  %1254 = vmatpush.bf16.msra.mxu0 %v2495_v3 }
  0x10   :  { %v2478_v11 = vld [vmem:[#allocation2 + $0xc0] sm:$0xf]  ;;  %v2879_v12 = vor.u32 %v3614_v10, %v2878_v9  ;;  %v3514_v13 = vld [vmem:[#allocation2 + $0xcc] sm:$0xf0]  ;;  %1267 = vmatpush.bf16.msra.mxu1 %v2623_v7 }
  0x11   :  { %v2606_v14 = vld [vmem:[#allocation2 + $0x1c0] sm:$0xf]  ;;  %v3546_v15 = vld [vmem:[#allocation2 + $0x1cc] sm:$0xf0]  ;;  %1280 = vmatpush.bf16.msra.mxu2 %v2751_v8  ;;  %v2479_v16 = vor.u32 %v3514_v13, %v2478_v11 }
  0x12   :  { %v2607_v17 = vor.u32 %v3546_v15, %v2606_v14  ;;  %v2734_v18 = vld [vmem:[#allocation2 + $0x2c0] sm:$0xf]  ;;  %v3578_v19 = vld [vmem:[#allocation2 + $0x2cc] sm:$0xf0]  ;;  %1293 = vmatpush.bf16.msra.mxu3 %v2879_v12 }
  0x13   :  { %v2862_v20 = vld [vmem:[#allocation2 + $0x3c0] sm:$0xf]  ;;  %v2735_v21 = vor.u32 %v3578_v19, %v2734_v18  ;;  %v3610_v22 = vld [vmem:[#allocation2 + $0x3cc] sm:$0xf0]  ;;  %1255 = vmatpush.bf16.msra.mxu0 %v2479_v16 }
  0x14   :  { %v2462_v23 = vld [vmem:[#allocation2 + $0xa0] sm:$0xf]  ;;  %v3510_v24 = vld [vmem:[#allocation2 + $0xac] sm:$0xf0]  ;;  %v2863_v25 = vor.u32 %v3610_v22, %v2862_v20  ;;  %1268 = vmatpush.bf16.msra.mxu1 %v2607_v17 }
  0x15   :  { %v2590_v26 = vld [vmem:[#allocation2 + $0x1a0] sm:$0xf]  ;;  %v3542_v27 = vld [vmem:[#allocation2 + $0x1ac] sm:$0xf0]  ;;  %v2463_v29 = vor.u32 %v3510_v24, %v2462_v23  ;;  %1281 = vmatpush.bf16.msra.mxu2 %v2735_v21 }
  0x16   :  { %v2718_v28 = vld [vmem:[#allocation2 + $0x2a0] sm:$0xf]  ;;  %v3574_v30 = vld [vmem:[#allocation2 + $0x2ac] sm:$0xf0]  ;;  %v2591_v33 = vor.u32 %v3542_v27, %v2590_v26  ;;  %1294 = vmatpush.bf16.msra.mxu3 %v2863_v25 }
  0x17   :  { %v2846_v31 = vld [vmem:[#allocation2 + $0x3a0] sm:$0xf]  ;;  %v3606_v32 = vld [vmem:[#allocation2 + $0x3ac] sm:$0xf0]  ;;  %v2719_v34 = vor.u32 %v3574_v30, %v2718_v28  ;;  %1256 = vmatpush.bf16.msra.mxu0 %v2463_v29 }
  0x18   :  { %v2446_v35 = vld [vmem:[#allocation2 + $0x80] sm:$0xf]  ;;  %v3506_v36 = vld [vmem:[#allocation2 + $0x8c] sm:$0xf0]  ;;  %v2847_v38 = vor.u32 %v3606_v32, %v2846_v31  ;;  %1269 = vmatpush.bf16.msra.mxu1 %v2591_v33  ;;  %v3516_v33 = vld [vmem:[#allocation2 + $0xe4] sm:$0xf] }
  0x19   :  { %v2574_v37 = vld [vmem:[#allocation2 + $0x180] sm:$0xf]  ;;  %v3538_v39 = vld [vmem:[#allocation2 + $0x18c] sm:$0xf0]  ;;  %v2447_v44 = vor.u32 %v3506_v36, %v2446_v35  ;;  %1282 = vmatpush.bf16.msra.mxu2 %v2719_v34  ;;  %v2496_v34 = vld [vmem:[#allocation2 + $0xf0] sm:$0xf0] }
  0x1a   :  { %v2702_v40 = vld [vmem:[#allocation2 + $0x280] sm:$0xf]  ;;  %v3570_v41 = vld [vmem:[#allocation2 + $0x28c] sm:$0xf0]  ;;  %v2575_v45 = vor.u32 %v3538_v39, %v2574_v37  ;;  %1295 = vmatpush.bf16.msra.mxu3 %v2847_v38  ;;  %v62_v35 = vld [vmem:[%s4076_s0 + $0x10] sm:$0xff] }
  0x1b   :  { %v2830_v42 = vld [vmem:[#allocation2 + $0x380] sm:$0xf]  ;;  %v3602_v43 = vld [vmem:[#allocation2 + $0x38c] sm:$0xf0]  ;;  %v2703_v46 = vor.u32 %v3570_v41, %v2702_v40  ;;  %1257 = vmatpush.bf16.msra.mxu0 %v2447_v44  ;;  %v60_v40 = vld [vmem:[%s4076_s0] sm:$0xff] }
  0x1c   :  { %v2430_v47 = vld [vmem:[#allocation2 + $0x60] sm:$0xf]  ;;  %v3502_v48 = vld [vmem:[#allocation2 + $0x6c] sm:$0xf0]  ;;  %v2831_v50 = vor.u32 %v3602_v43, %v2830_v42  ;;  %1270 = vmatpush.bf16.msra.mxu1 %v2575_v45  ;;  %v3548_v43 = vld [vmem:[#allocation2 + $0x1e4] sm:$0xf] }
  0x1d   :  { %v2558_v49 = vld [vmem:[#allocation2 + $0x160] sm:$0xf]  ;;  %v3534_v51 = vld [vmem:[#allocation2 + $0x16c] sm:$0xf0]  ;;  %v2431_v56 = vor.u32 %v3502_v48, %v2430_v47  ;;  %1283 = vmatpush.bf16.msra.mxu2 %v2703_v46  ;;  %v2624_v44 = vld [vmem:[#allocation2 + $0x1f0] sm:$0xf0]  ;;  %v2499_v47 = vor.u32 %v3516_v33, %v2496_v34 }
  0x1e   :  { %v2686_v52 = vld [vmem:[#allocation2 + $0x260] sm:$0xf]  ;;  %v3566_v53 = vld [vmem:[#allocation2 + $0x26c] sm:$0xf0]  ;;  %v2559_v57 = vor.u32 %v3534_v51, %v2558_v49  ;;  %1296 = vmatpush.bf16.msra.mxu3 %v2831_v50  ;;  %v3916_v51 = vpack.c.bf16 %v62_v35, %v62_v35  ;;  %v3532_v35 = vld [vmem:[#allocation2 + $0x164] sm:$0xf] }
  0x1f   :  { %v2814_v54 = vld [vmem:[#allocation2 + $0x360] sm:$0xf]  ;;  %v3598_v55 = vld [vmem:[#allocation2 + $0x36c] sm:$0xf0]  ;;  %v2687_v58 = vor.u32 %v3566_v53, %v2686_v52  ;;  %1258 = vmatpush.bf16.msra.mxu0 %v2431_v56  ;;  %v3512_v53 = vld [vmem:[#allocation2 + $0xc4] sm:$0xf] }
  0x20   :  { %v2414_v59 = vld [vmem:[#allocation2 + $0x40] sm:$0xf]  ;;  %v3498_v60 = vld [vmem:[#allocation2 + $0x4c] sm:$0xf0]  ;;  %v2815_v62 = vor.u32 %v3598_v55, %v2814_v54  ;;  %1271 = vmatpush.bf16.msra.mxu1 %v2559_v57  ;;  %v2480_v54 = vld [vmem:[#allocation2 + $0xd0] sm:$0xf0]  ;;  %v3918_v55 = vpack.c.bf16 %v60_v40, %v60_v40 }
  0x21   :  { %v2542_v61 = vld [vmem:[#allocation2 + $0x140] sm:$0xf]  ;;  %v3530_v63 = vld [vmem:[#allocation2 + $0x14c] sm:$0xf0]  ;;  %v2415_v4 = vor.u32 %v3498_v60, %v2414_v59  ;;  %1284 = vmatpush.bf16.msra.mxu2 %v2687_v58  ;;  %v2627_v59 = vor.u32 %v3548_v43, %v2624_v44  ;;  %v3496_v43 = vld [vmem:[#allocation2 + $0x44] sm:$0xf] }
  0x22   :  { %v2670_v0 = vld [vmem:[#allocation2 + $0x240] sm:$0xf]  ;;  %v3562_v1 = vld [vmem:[#allocation2 + $0x24c] sm:$0xf0]  ;;  %v2543_v5 = vor.u32 %v3530_v63, %v2542_v61  ;;  %1297 = vmatpush.bf16.msra.mxu3 %v2815_v62  ;;  %v3544_v61 = vld [vmem:[#allocation2 + $0x1c4] sm:$0xf] }
  0x23   :  { %v2798_v2 = vld [vmem:[#allocation2 + $0x340] sm:$0xf]  ;;  %v3594_v3 = vld [vmem:[#allocation2 + $0x34c] sm:$0xf0]  ;;  %v2671_v6 = vor.u32 %v3562_v1, %v2670_v0  ;;  %1259 = vmatpush.bf16.msra.mxu0 %v2415_v4  ;;  %v2608_v62 = vld [vmem:[#allocation2 + $0x1d0] sm:$0xf0]  ;;  %v2483_v0 = vor.u32 %v3512_v53, %v2480_v54 }
  0x24   :  { %v2398_v7 = vld [vmem:[#allocation2 + $0x20] sm:$0xf]  ;;  %v3494_v8 = vld [vmem:[#allocation2 + $0x2c] sm:$0xf0]  ;;  %v2799_v10 = vor.u32 %v3594_v3, %v2798_v2  ;;  %1272 = vmatpush.bf16.msra.mxu1 %v2543_v5  ;;  %v2416_v44 = vld [vmem:[#allocation2 + $0x50] sm:$0xf0] }
  0x25   :  { %v2526_v9 = vld [vmem:[#allocation2 + $0x120] sm:$0xf]  ;;  %v3526_v11 = vld [vmem:[#allocation2 + $0x12c] sm:$0xf0]  ;;  %v2399_v16 = vor.u32 %v3494_v8, %v2398_v7  ;;  %1285 = vmatpush.bf16.msra.mxu2 %v2671_v6  ;;  %v3508_v6 = vld [vmem:[#allocation2 + $0xa4] sm:$0xf]  ;;  %v2611_v8 = vor.u32 %v3544_v61, %v2608_v62 }
  0x26   :  { %v2654_v12 = vld [vmem:[#allocation2 + $0x220] sm:$0xf]  ;;  %v3558_v13 = vld [vmem:[#allocation2 + $0x22c] sm:$0xf0]  ;;  %v2527_v20 = vor.u32 %v3526_v11, %v2526_v9  ;;  %1298 = vmatpush.bf16.msra.mxu3 %v2799_v10  ;;  %v2464_v7 = vld [vmem:[#allocation2 + $0xb0] sm:$0xf0] }
  0x27   :  { %v2782_v14 = vld [vmem:[#allocation2 + $0x320] sm:$0xf]  ;;  %v3590_v15 = vld [vmem:[#allocation2 + $0x32c] sm:$0xf0]  ;;  %v2655_v21 = vor.u32 %v3558_v13, %v2654_v12  ;;  %1260 = vmatpush.bf16.msra.mxu0 %v2399_v16  ;;  %v3540_v10 = vld [vmem:[#allocation2 + $0x1a4] sm:$0xf]  ;;  %v2467_v13 = vor.u32 %v3508_v6, %v2464_v7 }
  0x28   :  { %v2382_v17 = vld [vmem:[#allocation2] sm:$0xf]  ;;  %v3490_v18 = vld [vmem:[#allocation2 + $0xc] sm:$0xf0]  ;;  %v2783_v25 = vor.u32 %v3590_v15, %v2782_v14  ;;  %1273 = vmatpush.bf16.msra.mxu1 %v2527_v20  ;;  %v2592_v11 = vld [vmem:[#allocation2 + $0x1b0] sm:$0xf0] }
  0x29   :  { %v2510_v19 = vld [vmem:[#allocation2 + $0x100] sm:$0xf]  ;;  %v3522_v22 = vld [vmem:[#allocation2 + $0x10c] sm:$0xf0]  ;;  %v2383_v32 = vor.u32 %v3490_v18, %v2382_v17  ;;  %1286 = vmatpush.bf16.msra.mxu2 %v2655_v21  ;;  %v3504_v18 = vld [vmem:[#allocation2 + $0x84] sm:$0xf]  ;;  %v2595_v20 = vor.u32 %v3540_v10, %v2592_v11 }
  0x2a   :  { %v2638_v23 = vld [vmem:[#allocation2 + $0x200] sm:$0xf]  ;;  %v3554_v24 = vld [vmem:[#allocation2 + $0x20c] sm:$0xf0]  ;;  %v2511_v36 = vor.u32 %v3522_v22, %v2510_v19  ;;  %1299 = vmatpush.bf16.msra.mxu3 %v2783_v25  ;;  %v2448_v19 = vld [vmem:[#allocation2 + $0x90] sm:$0xf0] }
  0x2b   :  { %v2766_v26 = vld [vmem:[#allocation2 + $0x300] sm:$0xf]  ;;  %v3586_v27 = vld [vmem:[#allocation2 + $0x30c] sm:$0xf0]  ;;  %v2639_v37 = vor.u32 %v3554_v24, %v2638_v23  ;;  %1261 = vmatpush.bf16.msra.mxu0 %v2383_v32  ;;  %v3536_v22 = vld [vmem:[#allocation2 + $0x184] sm:$0xf]  ;;  %v2451_v25 = vor.u32 %v3504_v18, %v2448_v19 }
  0x2c   :  { %v3006_v28 = vld [vmem:[#allocation2 + $0x4e0] sm:$0xf]  ;;  %v3646_v29 = vld [vmem:[#allocation2 + $0x4ec] sm:$0xf0]  ;;  %v2767_v41 = vor.u32 %v3586_v27, %v2766_v26  ;;  %1274 = vmatpush.bf16.msra.mxu1 %v2511_v36  ;;  %v2576_v23 = vld [vmem:[#allocation2 + $0x190] sm:$0xf0] }
  0x2d   :  { %v3134_v30 = vld [vmem:[#allocation2 + $0x5e0] sm:$0xf]  ;;  %v3678_v31 = vld [vmem:[#allocation2 + $0x5ec] sm:$0xf0]  ;;  %v3007_v42 = vor.u32 %v3646_v29, %v3006_v28  ;;  %1287 = vmatpush.bf16.msra.mxu2 %v2639_v37  ;;  %v66_v32 = vld [vmem:[%s4076_s0 + $0x30] sm:$0xff]  ;;  %v2579_v33 = vor.u32 %v3536_v22, %v2576_v23 }
  0x2e   :  { %v3150_v38 = vld [vmem:[#allocation2 + $0x600] sm:$0xf]  ;;  %v3682_v39 = vld [vmem:[#allocation2 + $0x60c] sm:$0xf0]  ;;  %v3135_v46 = vor.u32 %v3678_v31, %v3134_v30  ;;  %1300 = vmatpush.bf16.msra.mxu3 %v2767_v41  ;;  %1262 = vmatmul.bf16.vlgmr.msra.gmra.mxu0 %v3918_v55  ;;  %v3500_v30 = vld [vmem:[#allocation2 + $0x64] sm:$0xf] }
  0x2f   :  { %v63_v45 = vld [vmem:[%s4076_s0 + $0x18] sm:$0xff]  ;;  %v2990_v48 = vld [vmem:[#allocation2 + $0x4c0] sm:$0xf]  ;;  %v3151_v56 = vor.u32 %v3682_v39, %v3150_v38  ;;  %1306 = vmatpush.bf16.msrb.mxu0 %v3007_v42  ;;  %v3580_v10 = vld [vmem:[#allocation2 + $0x2e4] sm:$0xf] }
  0x30   :  { %v3642_v49 = vld [vmem:[#allocation2 + $0x4cc] sm:$0xf0]  ;;  %v3118_v50 = vld [vmem:[#allocation2 + $0x5c0] sm:$0xf]  ;;  %v3920_v57 = vpack.c.bf16 %v63_v45, %v63_v45  ;;  %1319 = vmatpush.bf16.msrb.mxu1 %v3135_v46  ;;  %1288 = vmatmul.bf16.vlgmr.msra.gmra.mxu2 %v3916_v51  ;;  %v2432_v31 = vld [vmem:[#allocation2 + $0x70] sm:$0xf0]  ;;  %v3934_v45 = vpack.c.bf16 %v66_v32, %v66_v32 }
  0x31   :  { %v3674_v52 = vld [vmem:[#allocation2 + $0x5cc] sm:$0xf0]  ;;  %v61_v58 = vld [vmem:[%s4076_s0 + $0x8] sm:$0xff]  ;;  %v2991_v60 = vor.u32 %v3642_v49, %v2990_v48  ;;  %1339 = vmatpush.bf16.msrb.mxu2 %v3151_v56  ;;  %v2560_v36 = vld [vmem:[#allocation2 + $0x170] sm:$0xf0]  ;;  %v2435_v38 = vor.u32 %v3500_v30, %v2432_v31 }
  0x32   :  { %1345 = vmatpush.bf16.msrb.mxu3 %v2499_v47  ;;  %v3119_v63 = vor.u32 %v3674_v52, %v3118_v50  ;;  %v2974_v1 = vld [vmem:[#allocation2 + $0x4a0] sm:$0xf]  ;;  %v3638_v2 = vld [vmem:[#allocation2 + $0x4ac] sm:$0xf0]  ;;  %v3927_v4 = vpack.c.bf16 %v61_v58, %v61_v58  ;;  %v2563_v46 = vor.u32 %v3532_v35, %v2560_v36  ;;  %v3528_v48 = vld [vmem:[#allocation2 + $0x144] sm:$0xf]  ;;  %v2419_v52 = vor.u32 %v3496_v43, %v2416_v44 }
  0x33   :  { %v3102_v3 = vld [vmem:[#allocation2 + $0x5a0] sm:$0xf]  ;;  %v3670_v5 = vld [vmem:[#allocation2 + $0x5ac] sm:$0xf0]  ;;  %1301 = vmatmul.bf16.vlgmr.msra.gmra.mxu3 %v3920_v57  ;;  %1307 = vmatpush.bf16.msrb.mxu0 %v2991_v60  ;;  %v2975_v9 = vor.u32 %v3638_v2, %v2974_v1  ;;  %v2544_v49 = vld [vmem:[#allocation2 + $0x150] sm:$0xf0] }
  0x34   :  { %1320 = vmatpush.bf16.msrb.mxu1 %v3119_v63  ;;  %v3103_v12 = vor.u32 %v3670_v5, %v3102_v3  ;;  %v2958_v14 = vld [vmem:[#allocation2 + $0x480] sm:$0xf]  ;;  %v3634_v15 = vld [vmem:[#allocation2 + $0x48c] sm:$0xf0]  ;;  %v2400_v60 = vld [vmem:[#allocation2 + $0x30] sm:$0xf0]  ;;  %v2547_v61 = vor.u32 %v3528_v48, %v2544_v49 }
  0x35   :  { %1358 = vmatpush.bf16.msra.mxu2 %v2627_v59  ;;  %v3086_v16 = vld [vmem:[#allocation2 + $0x580] sm:$0xf]  ;;  %1275 = vmatmul.bf16.vlgmr.msra.gmra.mxu1 %v3927_v4  ;;  %v3666_v17 = vld [vmem:[#allocation2 + $0x58c] sm:$0xf0]  ;;  %v2959_v21 = vor.u32 %v3634_v15, %v2958_v14  ;;  %v3492_v59 = vld [vmem:[#allocation2 + $0x24] sm:$0xf] }
  0x36   :  { %1346 = vmatpush.bf16.msrb.mxu3 %v2483_v0  ;;  %v3087_v24 = vor.u32 %v3666_v17, %v3086_v16  ;;  %v2942_v26 = vld [vmem:[#allocation2 + $0x460] sm:$0xf]  ;;  %v3630_v27 = vld [vmem:[#allocation2 + $0x46c] sm:$0xf0]  ;;  %v3524_v63 = vld [vmem:[#allocation2 + $0x124] sm:$0xf]  ;;  %v2403_v3 = vor.u32 %v3492_v59, %v2400_v60 }
  0x37   :  { %1308 = vmatpush.bf16.msrb.mxu0 %v2975_v9  ;;  %v3070_v28 = vld [vmem:[#allocation2 + $0x560] sm:$0xf]  ;;  %v3662_v29 = vld [vmem:[#allocation2 + $0x56c] sm:$0xf0]  ;;  %v2943_v34 = vor.u32 %v3630_v27, %v2942_v26  ;;  %v2528_v0 = vld [vmem:[#allocation2 + $0x130] sm:$0xf0] }
  0x38   :  { %1321 = vmatpush.bf16.msrb.mxu1 %v3103_v12  ;;  %v3071_v37 = vor.u32 %v3662_v29, %v3070_v28  ;;  %v2926_v39 = vld [vmem:[#allocation2 + $0x440] sm:$0xf]  ;;  %v3626_v40 = vld [vmem:[#allocation2 + $0x44c] sm:$0xf0]  ;;  %v2384_v9 = vld [vmem:[#allocation2 + $0x10] sm:$0xf0]  ;;  %v2531_v14 = vor.u32 %v3524_v63, %v2528_v0 }
  0x39   :  { %1359 = vmatpush.bf16.msra.mxu2 %v2611_v8  ;;  %v3054_v41 = vld [vmem:[#allocation2 + $0x540] sm:$0xf]  ;;  %v3658_v42 = vld [vmem:[#allocation2 + $0x54c] sm:$0xf0]  ;;  %v2927_v47 = vor.u32 %v3626_v40, %v2926_v39  ;;  %v3488_v8 = vld [vmem:[#allocation2 + $0x4] sm:$0xf] }
  0x3a   :  { %1347 = vmatpush.bf16.msrb.mxu3 %v2467_v13  ;;  %v3055_v50 = vor.u32 %v3658_v42, %v3054_v41  ;;  %v2910_v53 = vld [vmem:[#allocation2 + $0x420] sm:$0xf]  ;;  %v3622_v54 = vld [vmem:[#allocation2 + $0x42c] sm:$0xf0]  ;;  %v2752_v11 = vld [vmem:[#allocation2 + $0x2f0] sm:$0xf0] }
  0x3b   :  { %1309 = vmatpush.bf16.msrb.mxu0 %v2959_v21  ;;  %v3038_v56 = vld [vmem:[#allocation2 + $0x520] sm:$0xf]  ;;  %v3654_v58 = vld [vmem:[#allocation2 + $0x52c] sm:$0xf0]  ;;  %v2911_v62 = vor.u32 %v3622_v54, %v2910_v53  ;;  %v3612_v12 = vld [vmem:[#allocation2 + $0x3e4] sm:$0xf] }
  0x3c   :  { %1322 = vmatpush.bf16.msrb.mxu1 %v3087_v24  ;;  %v2894_v1 = vld [vmem:[#allocation2 + $0x400] sm:$0xf]  ;;  %v3039_v2 = vor.u32 %v3654_v58, %v3038_v56  ;;  %v3618_v5 = vld [vmem:[#allocation2 + $0x40c] sm:$0xf0]  ;;  %v2880_v13 = vld [vmem:[#allocation2 + $0x3f0] sm:$0xf0]  ;;  %v2755_v24 = vor.u32 %v3580_v10, %v2752_v11 }
  0x3d   :  { %1360 = vmatpush.bf16.msra.mxu2 %v2595_v20  ;;  %v3022_v6 = vld [vmem:[#allocation2 + $0x500] sm:$0xf]  ;;  %v3650_v7 = vld [vmem:[#allocation2 + $0x50c] sm:$0xf0]  ;;  %v2895_v15 = vor.u32 %v3618_v5, %v2894_v1  ;;  %v3644_v16 = vld [vmem:[#allocation2 + $0x4e4] sm:$0xf]  ;;  %v2387_v20 = vor.u32 %v3488_v8, %v2384_v9 }
  0x3e   :  { %1348 = vmatpush.bf16.msrb.mxu3 %v2451_v25  ;;  %v3008_v17 = vld [vmem:[#allocation2 + $0x4f0] sm:$0xf0]  ;;  %v64_v18 = vld [vmem:[%s4076_s0 + $0x20] sm:$0xff]  ;;  %v3023_v19 = vor.u32 %v3650_v7, %v3022_v6  ;;  %v3520_v21 = vld [vmem:[#allocation2 + $0x104] sm:$0xf]  ;;  %v2883_v25 = vor.u32 %v3612_v12, %v2880_v13 }
  0x3f   :  { %1310 = vmatpush.bf16.msrb.mxu0 %v2943_v34  ;;  %v2512_v22 = vld [vmem:[#allocation2 + $0x110] sm:$0xf0]  ;;  %v65_v23 = vld [vmem:[%s4076_s0 + $0x28] sm:$0xff]  ;;  %v3011_v29 = vor.u32 %v3644_v16, %v3008_v17  ;;  %v3944_v30 = vpack.c.bf16 %v64_v18, %v64_v18 }
  0x40   :  { %1323 = vmatpush.bf16.msrb.mxu1 %v3071_v37  ;;  %3164 = vmatmul.msk.bf16.vlgmr.msrb.gmra.mxu2 %vm1250_vm0, %v3934_v45  ;;  %v3676_v26 = vld [vmem:[#allocation2 + $0x5e4] sm:$0xf]  ;;  %v3136_v27 = vld [vmem:[#allocation2 + $0x5f0] sm:$0xf0]  ;;  %v2515_v34 = vor.u32 %v3520_v21, %v2512_v22  ;;  %v3946_v35 = vpack.c.bf16 %v65_v23, %v65_v23 }
  0x41   :  { %1361 = vmatpush.bf16.msra.mxu2 %v2579_v33  ;;  %v3576_v28 = vld [vmem:[#allocation2 + $0x2c4] sm:$0xf]  ;;  %v2736_v31 = vld [vmem:[#allocation2 + $0x2d0] sm:$0xf0] }
  0x42   :  { %1349 = vmatpush.bf16.msrb.mxu3 %v2435_v38  ;;  %v3608_v32 = vld [vmem:[#allocation2 + $0x3c4] sm:$0xf]  ;;  %v2864_v33 = vld [vmem:[#allocation2 + $0x3d0] sm:$0xf0]  ;;  %v3139_v38 = vor.u32 %v3676_v26, %v3136_v27  ;;  %v2739_v39 = vor.u32 %v3576_v28, %v2736_v31 }
  0x43   :  { %1311 = vmatpush.bf16.msrb.mxu0 %v2927_v47  ;;  %v3640_v36 = vld [vmem:[#allocation2 + $0x4c4] sm:$0xf]  ;;  %v2992_v37 = vld [vmem:[#allocation2 + $0x4d0] sm:$0xf0]  ;;  %v2867_v40 = vor.u32 %v3608_v32, %v2864_v33 }
  0x44   :  { %1324 = vmatpush.bf16.msrb.mxu1 %v3055_v50  ;;  %v3672_v41 = vld [vmem:[#allocation2 + $0x5c4] sm:$0xf]  ;;  %v3120_v42 = vld [vmem:[#allocation2 + $0x5d0] sm:$0xf0]  ;;  %v2995_v44 = vor.u32 %v3640_v36, %v2992_v37 }
  0x45   :  { %1362 = vmatpush.bf16.msra.mxu2 %v2563_v46  ;;  %v3572_v43 = vld [vmem:[#allocation2 + $0x2a4] sm:$0xf]  ;;  %v2720_v46 = vld [vmem:[#allocation2 + $0x2b0] sm:$0xf0] }
  0x46   :  { %1350 = vmatpush.bf16.msrb.mxu3 %v2419_v52  ;;  %v3604_v47 = vld [vmem:[#allocation2 + $0x3a4] sm:$0xf]  ;;  %v2848_v48 = vld [vmem:[#allocation2 + $0x3b0] sm:$0xf0]  ;;  %v3123_v52 = vor.u32 %v3672_v41, %v3120_v42  ;;  %v2723_v53 = vor.u32 %v3572_v43, %v2720_v46 }
  0x47   :  { %1312 = vmatpush.bf16.msrb.mxu0 %v2911_v62  ;;  %v3636_v49 = vld [vmem:[#allocation2 + $0x4a4] sm:$0xf]  ;;  %v2976_v50 = vld [vmem:[#allocation2 + $0x4b0] sm:$0xf0]  ;;  %v2851_v54 = vor.u32 %v3604_v47, %v2848_v48 }
  0x48   :  { %1325 = vmatpush.bf16.msrb.mxu1 %v3039_v2  ;;  %v3668_v56 = vld [vmem:[#allocation2 + $0x5a4] sm:$0xf]  ;;  %v3104_v58 = vld [vmem:[#allocation2 + $0x5b0] sm:$0xf0]  ;;  %v2979_v60 = vor.u32 %v3636_v49, %v2976_v50 }
  0x49   :  { %1363 = vmatpush.bf16.msra.mxu2 %v2547_v61  ;;  %v3568_v59 = vld [vmem:[#allocation2 + $0x284] sm:$0xf]  ;;  %v2704_v61 = vld [vmem:[#allocation2 + $0x290] sm:$0xf0]  ;;  %v3107_v2 = vor.u32 %v3668_v56, %v3104_v58  ;;  %v2502_v56 = vld [vmem:[#allocation2 + $0xe8] sm:$0xf] }
  0x4a   :  { %1351 = vmatpush.bf16.msrb.mxu3 %v2403_v3  ;;  %v3600_v62 = vld [vmem:[#allocation2 + $0x384] sm:$0xf]  ;;  %v2832_v63 = vld [vmem:[#allocation2 + $0x390] sm:$0xf0]  ;;  %v2707_v3 = vor.u32 %v3568_v59, %v2704_v61  ;;  %v3519_v58 = vld [vmem:[#allocation2 + $0xf4] sm:$0xf0] }
  0x4b   :  { %1313 = vmatpush.bf16.msrb.mxu0 %v2895_v15  ;;  %v3632_v0 = vld [vmem:[#allocation2 + $0x484] sm:$0xf]  ;;  %v2960_v1 = vld [vmem:[#allocation2 + $0x490] sm:$0xf0]  ;;  %v2835_v5 = vor.u32 %v3600_v62, %v2832_v63  ;;  %v2630_v59 = vld [vmem:[#allocation2 + $0x1e8] sm:$0xf] }
  0x4c   :  { %1326 = vmatpush.bf16.msrb.mxu1 %v3023_v19  ;;  %v3664_v6 = vld [vmem:[#allocation2 + $0x584] sm:$0xf]  ;;  %v3088_v7 = vld [vmem:[#allocation2 + $0x590] sm:$0xf0]  ;;  %v2963_v9 = vor.u32 %v3632_v0, %v2960_v1  ;;  %v3551_v61 = vld [vmem:[#allocation2 + $0x1f4] sm:$0xf0] }
  0x4d   :  { %1364 = vmatpush.bf16.msra.mxu2 %v2531_v14  ;;  %v3564_v8 = vld [vmem:[#allocation2 + $0x264] sm:$0xf]  ;;  %v2688_v10 = vld [vmem:[#allocation2 + $0x270] sm:$0xf0]  ;;  %v3091_v15 = vor.u32 %v3664_v6, %v3088_v7  ;;  %v2503_v6 = vor.u32 %v3519_v58, %v2502_v56  ;;  %v2886_v7 = vld [vmem:[#allocation2 + $0x3e8] sm:$0xf] }
  0x4e   :  { %1352 = vmatpush.bf16.msrb.mxu3 %v2387_v20  ;;  %1314 = vmatmul.bf16.vlgmr.msrb.gmra.mxu0 %v3944_v30  ;;  %v3596_v11 = vld [vmem:[#allocation2 + $0x364] sm:$0xf]  ;;  %v2816_v12 = vld [vmem:[#allocation2 + $0x370] sm:$0xf0]  ;;  %v2691_v16 = vor.u32 %v3564_v8, %v2688_v10  ;;  %v3615_v8 = vld [vmem:[#allocation2 + $0x3f4] sm:$0xf0]  ;;  %v2631_v10 = vor.u32 %v3551_v61, %v2630_v59 }
  0x4f   :  { %1371 = vmatpush.bf16.msra.mxu0 %v2755_v24  ;;  %1327 = vmatmul.bf16.vlgmr.msrb.gmra.mxu1 %v3946_v35  ;;  %v3628_v13 = vld [vmem:[#allocation2 + $0x464] sm:$0xf]  ;;  %v2944_v14 = vld [vmem:[#allocation2 + $0x470] sm:$0xf0]  ;;  %v2819_v17 = vor.u32 %v3596_v11, %v2816_v12  ;;  %v3515_v11 = vld [vmem:[#allocation2 + $0xd4] sm:$0xf0] }
  0x50   :  { %1384 = vmatpush.bf16.msra.mxu1 %v2883_v25  ;;  %v3660_v18 = vld [vmem:[#allocation2 + $0x564] sm:$0xf]  ;;  %v3072_v19 = vld [vmem:[#allocation2 + $0x570] sm:$0xf0]  ;;  %v2947_v21 = vor.u32 %v3628_v13, %v2944_v14  ;;  %v2758_v13 = vld [vmem:[#allocation2 + $0x2e8] sm:$0xf] }
  0x51   :  { %1365 = vmatpush.bf16.msra.mxu2 %v2515_v34  ;;  %1353 = vmatmul.bf16.vlgmr.msrb.gmra.mxu3 %v3918_v55  ;;  %v3560_v20 = vld [vmem:[#allocation2 + $0x244] sm:$0xf]  ;;  %v2672_v22 = vld [vmem:[#allocation2 + $0x250] sm:$0xf0]  ;;  %v3075_v27 = vor.u32 %v3660_v18, %v3072_v19  ;;  %v3583_v14 = vld [vmem:[#allocation2 + $0x2f4] sm:$0xf0]  ;;  %v2887_v18 = vor.u32 %v3615_v8, %v2886_v7 }
  0x52   :  { %1397 = vmatpush.bf16.msra.mxu3 %v3011_v29  ;;  %v3592_v23 = vld [vmem:[#allocation2 + $0x344] sm:$0xf]  ;;  %v2800_v24 = vld [vmem:[#allocation2 + $0x350] sm:$0xf0]  ;;  %v2675_v28 = vor.u32 %v3560_v20, %v2672_v22  ;;  %v2870_v20 = vld [vmem:[#allocation2 + $0x3c8] sm:$0xf] }
  0x53   :  { %1372 = vmatpush.bf16.msra.mxu0 %v2739_v39  ;;  %v3624_v25 = vld [vmem:[#allocation2 + $0x444] sm:$0xf]  ;;  %v2928_v26 = vld [vmem:[#allocation2 + $0x450] sm:$0xf0]  ;;  %v2803_v29 = vor.u32 %v3592_v23, %v2800_v24  ;;  %v2470_v22 = vld [vmem:[#allocation2 + $0xa8] sm:$0xf]  ;;  %v2759_v23 = vor.u32 %v3583_v14, %v2758_v13 }
  0x54   :  { %1385 = vmatpush.bf16.msra.mxu1 %v2867_v40  ;;  %1366 = vmatmul.bf16.vlgmr.msra.gmra.mxu2 %v3927_v4  ;;  %v3656_v31 = vld [vmem:[#allocation2 + $0x544] sm:$0xf]  ;;  %v3056_v32 = vld [vmem:[#allocation2 + $0x550] sm:$0xf0]  ;;  %v2931_v34 = vor.u32 %v3624_v25, %v2928_v26  ;;  %v3511_v25 = vld [vmem:[#allocation2 + $0xb4] sm:$0xf0] }
  0x55   :  { %1410 = vmatpush.bf16.msrb.mxu2 %v3139_v38  ;;  %v3556_v33 = vld [vmem:[#allocation2 + $0x224] sm:$0xf]  ;;  %v2656_v36 = vld [vmem:[#allocation2 + $0x230] sm:$0xf0]  ;;  %v3059_v41 = vor.u32 %v3656_v31, %v3056_v32  ;;  %v2742_v26 = vld [vmem:[#allocation2 + $0x2c8] sm:$0xf]  ;;  %v2471_v32 = vor.u32 %v3511_v25, %v2470_v22 }
  0x56   :  { %1398 = vmatpush.bf16.msra.mxu3 %v2995_v44  ;;  %v3588_v37 = vld [vmem:[#allocation2 + $0x324] sm:$0xf]  ;;  %v2784_v38 = vld [vmem:[#allocation2 + $0x330] sm:$0xf0]  ;;  %v2659_v46 = vor.u32 %v3556_v33, %v2656_v36  ;;  %v2854_v33 = vld [vmem:[#allocation2 + $0x3a8] sm:$0xf] }
  0x57   :  { %1373 = vmatpush.bf16.msra.mxu0 %v2723_v53  ;;  %v3620_v39 = vld [vmem:[#allocation2 + $0x424] sm:$0xf]  ;;  %v2912_v40 = vld [vmem:[#allocation2 + $0x430] sm:$0xf0]  ;;  %v2787_v47 = vor.u32 %v3588_v37, %v2784_v38  ;;  %v2454_v36 = vld [vmem:[#allocation2 + $0x88] sm:$0xf] }
  0x58   :  { %1386 = vmatpush.bf16.msra.mxu1 %v2851_v54  ;;  %v3652_v42 = vld [vmem:[#allocation2 + $0x524] sm:$0xf]  ;;  %v3040_v43 = vld [vmem:[#allocation2 + $0x530] sm:$0xf0]  ;;  %v3571_v56 = vld [vmem:[#allocation2 + $0x294] sm:$0xf0] }
  0x59   :  { %1411 = vmatpush.bf16.msrb.mxu2 %v3123_v52  ;;  %v3552_v44 = vld [vmem:[#allocation2 + $0x204] sm:$0xf]  ;;  %v2640_v48 = vld [vmem:[#allocation2 + $0x210] sm:$0xf0]  ;;  %v2915_v52 = vor.u32 %v3620_v39, %v2912_v40  ;;  %v3507_v39 = vld [vmem:[#allocation2 + $0x94] sm:$0xf0] }
  0x5a   :  { %1399 = vmatpush.bf16.msra.mxu3 %v2979_v60  ;;  %v3584_v49 = vld [vmem:[#allocation2 + $0x304] sm:$0xf]  ;;  %v2768_v50 = vld [vmem:[#allocation2 + $0x310] sm:$0xf0]  ;;  %v3043_v60 = vor.u32 %v3652_v42, %v3040_v43  ;;  %v2643_v0 = vor.u32 %v3552_v44, %v2640_v48  ;;  %v2726_v40 = vld [vmem:[#allocation2 + $0x2a8] sm:$0xf] }
  0x5b   :  { %1374 = vmatpush.bf16.msra.mxu0 %v2707_v3  ;;  %v3616_v53 = vld [vmem:[#allocation2 + $0x404] sm:$0xf]  ;;  %v2896_v54 = vld [vmem:[#allocation2 + $0x410] sm:$0xf0]  ;;  %v2771_v1 = vor.u32 %v3584_v49, %v2768_v50  ;;  %v2582_v42 = vld [vmem:[#allocation2 + $0x188] sm:$0xf] }
  0x5c   :  { %1387 = vmatpush.bf16.msra.mxu1 %v2835_v5  ;;  %v3680_v62 = vld [vmem:[#allocation2 + $0x604] sm:$0xf]  ;;  %v3152_v63 = vld [vmem:[#allocation2 + $0x610] sm:$0xf0]  ;;  %v2899_v5 = vor.u32 %v3616_v53, %v2896_v54  ;;  %v3539_v43 = vld [vmem:[#allocation2 + $0x194] sm:$0xf0] }
  0x5d   :  { %1412 = vmatpush.bf16.msrb.mxu2 %v3107_v2  ;;  %v3648_v2 = vld [vmem:[#allocation2 + $0x504] sm:$0xf]  ;;  %v3024_v3 = vld [vmem:[#allocation2 + $0x510] sm:$0xf0]  ;;  %v3155_v12 = vor.u32 %v3680_v62, %v3152_v63  ;;  %v3603_v48 = vld [vmem:[#allocation2 + $0x394] sm:$0xf0] }
  0x5e   :  { %1400 = vmatpush.bf16.msra.mxu3 %v2963_v9  ;;  %v2486_v9 = vld [vmem:[#allocation2 + $0xc8] sm:$0xf]  ;;  %v3503_v53 = vld [vmem:[#allocation2 + $0x74] sm:$0xf0] }
  0x5f   :  { %1375 = vmatpush.bf16.msra.mxu0 %v2691_v16  ;;  %v2614_v16 = vld [vmem:[#allocation2 + $0x1c8] sm:$0xf]  ;;  %v2487_v19 = vor.u32 %v3515_v11, %v2486_v9  ;;  %v3535_v59 = vld [vmem:[#allocation2 + $0x174] sm:$0xf0] }
  0x60   :  { %1388 = vmatpush.bf16.msra.mxu1 %v2819_v17  ;;  %v3547_v17 = vld [vmem:[#allocation2 + $0x1d4] sm:$0xf0]  ;;  %v2438_v49 = vld [vmem:[#allocation2 + $0x68] sm:$0xf] }
  0x61   :  { %1413 = vmatpush.bf16.msrb.mxu2 %v3091_v15  ;;  %v3027_v15 = vor.u32 %v3648_v2, %v3024_v3  ;;  %v2615_v24 = vor.u32 %v3547_v17, %v2614_v16  ;;  %v2710_v54 = vld [vmem:[#allocation2 + $0x288] sm:$0xf]  ;;  %v2439_v61 = vor.u32 %v3503_v53, %v2438_v49  ;;  %v3599_v63 = vld [vmem:[#allocation2 + $0x374] sm:$0xf0] }
  0x62   :  { %1401 = vmatpush.bf16.msra.mxu3 %v2947_v21  ;;  %v3611_v21 = vld [vmem:[#allocation2 + $0x3d4] sm:$0xf0]  ;;  %v2566_v58 = vld [vmem:[#allocation2 + $0x168] sm:$0xf] }
  0x63   :  { %1376 = vmatpush.bf16.msra.mxu0 %v2675_v28  ;;  %v2598_v28 = vld [vmem:[#allocation2 + $0x1a8] sm:$0xf]  ;;  %v2871_v31 = vor.u32 %v3611_v21, %v2870_v20  ;;  %v2567_v2 = vor.u32 %v3535_v59, %v2566_v58  ;;  %v3499_v3 = vld [vmem:[#allocation2 + $0x54] sm:$0xf0] }
  0x64   :  { %1389 = vmatpush.bf16.msra.mxu1 %v2803_v29  ;;  %v3543_v29 = vld [vmem:[#allocation2 + $0x1b4] sm:$0xf0]  ;;  %v2822_v62 = vld [vmem:[#allocation2 + $0x368] sm:$0xf] }
  0x65   :  { %1414 = vmatpush.bf16.msrb.mxu2 %v3075_v27  ;;  %v3579_v27 = vld [vmem:[#allocation2 + $0x2d4] sm:$0xf0]  ;;  %v2599_v38 = vor.u32 %v3543_v29, %v2598_v28  ;;  %v2550_v7 = vld [vmem:[#allocation2 + $0x148] sm:$0xf]  ;;  %v2823_v9 = vor.u32 %v3599_v63, %v2822_v62 }
  0x66   :  { %1402 = vmatpush.bf16.msra.mxu3 %v2931_v34  ;;  %v3607_v34 = vld [vmem:[#allocation2 + $0x3b4] sm:$0xf0]  ;;  %v2743_v37 = vor.u32 %v3579_v27, %v2742_v26  ;;  %v2806_v11 = vld [vmem:[#allocation2 + $0x348] sm:$0xf] }
  0x67   :  { %1377 = vmatpush.bf16.msra.mxu0 %v2659_v46  ;;  %v2855_v44 = vor.u32 %v3607_v34, %v2854_v33  ;;  %v2455_v46 = vor.u32 %v3507_v39, %v2454_v36  ;;  %v3531_v8 = vld [vmem:[#allocation2 + $0x154] sm:$0xf0]  ;;  %v2406_v13 = vld [vmem:[#allocation2 + $0x28] sm:$0xf] }
  0x68   :  { %1390 = vmatpush.bf16.msra.mxu1 %v2787_v47  ;;  %v2838_v47 = vld [vmem:[#allocation2 + $0x388] sm:$0xf]  ;;  %v3495_v16 = vld [vmem:[#allocation2 + $0x34] sm:$0xf0] }
  0x69   :  { %1415 = vmatpush.bf16.msrb.mxu2 %v3059_v41  ;;  %v3575_v41 = vld [vmem:[#allocation2 + $0x2b4] sm:$0xf0]  ;;  %v2678_v17 = vld [vmem:[#allocation2 + $0x248] sm:$0xf] }
  0x6a   :  { %1403 = vmatpush.bf16.msra.mxu3 %v2915_v52  ;;  %v2727_v50 = vor.u32 %v3575_v41, %v2726_v40  ;;  %v2583_v52 = vor.u32 %v3539_v43, %v2582_v42  ;;  %v3527_v20 = vld [vmem:[#allocation2 + $0x134] sm:$0xf0]  ;;  %v2790_v22 = vld [vmem:[#allocation2 + $0x328] sm:$0xf] }
  0x6b   :  { %1378 = vmatpush.bf16.msra.mxu0 %v2643_v0  ;;  %v2422_v0 = vld [vmem:[#allocation2 + $0x48] sm:$0xf]  ;;  %v3491_v26 = vld [vmem:[#allocation2 + $0x14] sm:$0xf0] }
  0x6c   :  { %1391 = vmatpush.bf16.msra.mxu1 %v2771_v1  ;;  %v2711_v1 = vor.u32 %v3571_v56, %v2710_v54  ;;  %v2390_v25 = vld [vmem:[#allocation2 + $0x8] sm:$0xf]  ;;  %v3523_v33 = vld [vmem:[#allocation2 + $0x114] sm:$0xf0] }
  0x6d   :  { %1416 = vmatpush.bf16.msrb.mxu2 %v3043_v60  ;;  %v2839_v60 = vor.u32 %v3603_v48, %v2838_v47  ;;  %v2518_v29 = vld [vmem:[#allocation2 + $0x108] sm:$0xf]  ;;  %v3647_v36 = vld [vmem:[#allocation2 + $0x4f4] sm:$0xf0]  ;;  %v2391_v41 = vor.u32 %v3491_v26, %v2390_v25  ;;  %v3505_v25 = vld [vmem:[#allocation2 + $0x8c] sm:$0xf] }
  0x6e   :  { %1404 = vmatpush.bf16.msra.mxu3 %v2899_v5  ;;  %1379 = vmatmul.bf16.vlgmr.msra.gmra.mxu0 %v3916_v51  ;;  %v2694_v5 = vld [vmem:[#allocation2 + $0x268] sm:$0xf]  ;;  %v3679_v39 = vld [vmem:[#allocation2 + $0x5f4] sm:$0xf0]  ;;  %v2519_v47 = vor.u32 %v3523_v33, %v2518_v29  ;;  %v3541_v29 = vld [vmem:[#allocation2 + $0x1ac] sm:$0xf] }
  0x6f   :  { %1430 = vmatpush.bf16.msrb.mxu0 %v3155_v12  ;;  %1392 = vmatmul.bf16.vlgmr.msra.gmra.mxu1 %v3920_v57  ;;  %v3595_v12 = vld [vmem:[#allocation2 + $0x354] sm:$0xf0]  ;;  %v3014_v34 = vld [vmem:[#allocation2 + $0x4e8] sm:$0xf] }
  0x70   :  { %1436 = vmatpush.bf16.msrb.mxu1 %v2503_v6  ;;  %v3567_v6 = vld [vmem:[#allocation2 + $0x274] sm:$0xf0]  ;;  %v2807_v21 = vor.u32 %v3595_v12, %v2806_v11  ;;  %v2774_v40 = vld [vmem:[#allocation2 + $0x308] sm:$0xf]  ;;  %v3015_v48 = vor.u32 %v3647_v36, %v3014_v34 }
  0x71   :  { %1417 = vmatpush.bf16.msrb.mxu2 %v3027_v15  ;;  %1405 = vmatmul.bf16.vlgmr.msra.gmra.mxu3 %v3944_v30  ;;  %v2695_v14 = vor.u32 %v3567_v6, %v2694_v5  ;;  %v2551_v15 = vor.u32 %v3531_v8, %v2550_v7  ;;  %v3587_v42 = vld [vmem:[#allocation2 + $0x314] sm:$0xf0]  ;;  %v2998_v49 = vld [vmem:[#allocation2 + $0x4c8] sm:$0xf]  ;;  %v3549_v5 = vld [vmem:[#allocation2 + $0x1ec] sm:$0xf] }
  0x72   :  { %1449 = vmatpush.bf16.msrb.mxu3 %v2631_v10  ;;  %v2423_v10 = vor.u32 %v3499_v3, %v2422_v0  ;;  %v3643_v54 = vld [vmem:[#allocation2 + $0x4d4] sm:$0xf0]  ;;  %v3158_v56 = vld [vmem:[#allocation2 + $0x608] sm:$0xf]  ;;  %v2775_v59 = vor.u32 %v3587_v42, %v2774_v40  ;;  %v3513_v0 = vld [vmem:[#allocation2 + $0xcc] sm:$0xf] }
  0x73   :  { %1462 = vmatpush.bf16.msra.mxu0 %v2759_v23  ;;  %v2407_v23 = vor.u32 %v3495_v16, %v2406_v13  ;;  %v3683_v58 = vld [vmem:[#allocation2 + $0x614] sm:$0xf0]  ;;  %v2632_v6 = vld [vmem:[#allocation2 + $0x1f8] sm:$0xf0]  ;;  %v2982_v8 = vld [vmem:[#allocation2 + $0x4a8] sm:$0xf] }
  0x74   :  { %1437 = vmatpush.bf16.msrb.mxu1 %v2487_v19  ;;  %1418 = vmatmul.bf16.vlgmr.msrb.gmra.mxu2 %v3946_v35  ;;  %v2534_v19 = vld [vmem:[#allocation2 + $0x128] sm:$0xf]  ;;  %v3159_v3 = vor.u32 %v3683_v58, %v3158_v56  ;;  %v3671_v11 = vld [vmem:[#allocation2 + $0x5b4] sm:$0xf0]  ;;  %v3509_v13 = vld [vmem:[#allocation2 + $0xac] sm:$0xf] }
  0x75   :  { %1475 = vmatpush.bf16.msra.mxu2 %v2887_v18  ;;  %v3563_v18 = vld [vmem:[#allocation2 + $0x254] sm:$0xf0]  ;;  %v2535_v28 = vor.u32 %v3527_v20, %v2534_v19  ;;  %v2472_v16 = vld [vmem:[#allocation2 + $0xb8] sm:$0xf0]  ;;  %v2966_v20 = vld [vmem:[#allocation2 + $0x488] sm:$0xf] }
  0x76   :  { %1450 = vmatpush.bf16.msrb.mxu3 %v2615_v24  ;;  %v3591_v24 = vld [vmem:[#allocation2 + $0x334] sm:$0xf0]  ;;  %v2679_v27 = vor.u32 %v3563_v18, %v2678_v17  ;;  %v3545_v17 = vld [vmem:[#allocation2 + $0x1cc] sm:$0xf]  ;;  %v2616_v18 = vld [vmem:[#allocation2 + $0x1d8] sm:$0xf0] }
  0x77   :  { %1463 = vmatpush.bf16.msra.mxu0 %v2743_v37  ;;  %v2791_v37 = vor.u32 %v3591_v24, %v2790_v22  ;;  %v3094_v22 = vld [vmem:[#allocation2 + $0x588] sm:$0xf]  ;;  %v2475_v24 = vor.u32 %v3509_v13, %v2472_v16  ;;  %v2619_v26 = vor.u32 %v3545_v17, %v2616_v18  ;;  %v3631_v34 = vld [vmem:[#allocation2 + $0x474] sm:$0xf0]  ;;  %v2440_v42 = vld [vmem:[#allocation2 + $0x78] sm:$0xf0] }
  0x78   :  { %1438 = vmatpush.bf16.msrb.mxu1 %v2471_v32  ;;  %v3559_v32 = vld [vmem:[#allocation2 + $0x234] sm:$0xf0]  ;;  %v2950_v33 = vld [vmem:[#allocation2 + $0x468] sm:$0xf]  ;;  %v2424_v58 = vld [vmem:[#allocation2 + $0x58] sm:$0xf0] }
  0x79   :  { %1476 = vmatpush.bf16.msra.mxu2 %v2871_v31  ;;  %v2662_v31 = vld [vmem:[#allocation2 + $0x228] sm:$0xf]  ;;  %v2760_v16 = vld [vmem:[#allocation2 + $0x2f8] sm:$0xf0]  ;;  %v3613_v18 = vld [vmem:[#allocation2 + $0x3ec] sm:$0xf] }
  0x7a   :  { %1451 = vmatpush.bf16.msrb.mxu3 %v2599_v38  ;;  %v3142_v38 = vld [vmem:[#allocation2 + $0x5e8] sm:$0xf]  ;;  %v2663_v43 = vor.u32 %v3559_v32, %v2662_v31  ;;  %v2600_v31 = vld [vmem:[#allocation2 + $0x1b8] sm:$0xf0] }
  0x7b   :  { %1464 = vmatpush.bf16.msra.mxu0 %v2727_v50  ;;  %v2646_v50 = vld [vmem:[#allocation2 + $0x208] sm:$0xf]  ;;  %v3143_v53 = vor.u32 %v3679_v39, %v3142_v38  ;;  %v3501_v39 = vld [vmem:[#allocation2 + $0x6c] sm:$0xf]  ;;  %v2603_v40 = vor.u32 %v3541_v29, %v2600_v31  ;;  %v2744_v31 = vld [vmem:[#allocation2 + $0x2d8] sm:$0xf0] }
  0x7c   :  { %1439 = vmatpush.bf16.msrb.mxu1 %v2455_v46  ;;  %v2504_v46 = vld [vmem:[#allocation2 + $0xf8] sm:$0xf0]  ;;  %v3078_v36 = vld [vmem:[#allocation2 + $0x568] sm:$0xf] }
  0x7d   :  { %1477 = vmatpush.bf16.msra.mxu2 %v2855_v44  ;;  %v3517_v44 = vld [vmem:[#allocation2 + $0xec] sm:$0xf]  ;;  %v3030_v13 = vld [vmem:[#allocation2 + $0x508] sm:$0xf] }
  0x7e   :  { %1452 = vmatpush.bf16.msrb.mxu3 %v2583_v52  ;;  %3165 = vmatmul.msk.bf16.vlgmr.msrb.gmra.mxu0 %vm1250_vm0, %v3934_v45  ;;  %v3555_v52 = vld [vmem:[#allocation2 + $0x214] sm:$0xf0]  ;;  %v2507_v62 = vor.u32 %v3517_v44, %v2504_v46  ;;  %v2584_v44 = vld [vmem:[#allocation2 + $0x198] sm:$0xf0] }
  0x7f   :  { %1465 = vmatpush.bf16.msra.mxu0 %v2711_v1  ;;  %v2647_v63 = vor.u32 %v3555_v52, %v2646_v50  ;;  %v2999_v1 = vor.u32 %v3643_v54, %v2998_v49  ;;  %v3062_v49 = vld [vmem:[#allocation2 + $0x548] sm:$0xf]  ;;  %v3659_v50 = vld [vmem:[#allocation2 + $0x554] sm:$0xf0]  ;;  %v2443_v52 = vor.u32 %v3501_v39, %v2440_v42  ;;  %v3641_v39 = vld [vmem:[#allocation2 + $0x4cc] sm:$0xf] }
  0x80   :  { %1440 = vmatpush.bf16.msrb.mxu1 %v2439_v61  ;;  %v3675_v61 = vld [vmem:[#allocation2 + $0x5d4] sm:$0xf0]  ;;  %v3000_v42 = vld [vmem:[#allocation2 + $0x4d8] sm:$0xf0] }
  0x81   :  { %1478 = vmatpush.bf16.msra.mxu2 %v2839_v60  ;;  %v3126_v60 = vld [vmem:[#allocation2 + $0x5c8] sm:$0xf] }
  0x82   :  { %1453 = vmatpush.bf16.msrb.mxu3 %v2567_v2  ;;  %v2488_v2 = vld [vmem:[#allocation2 + $0xd8] sm:$0xf0]  ;;  %v3127_v7 = vor.u32 %v3675_v61, %v3126_v60  ;;  %v3063_v61 = vor.u32 %v3659_v50, %v3062_v49 }
  0x83   :  { %1466 = vmatpush.bf16.msra.mxu0 %v2695_v14  ;;  %v2491_v12 = vor.u32 %v3513_v0, %v2488_v2  ;;  %v2635_v14 = vor.u32 %v3549_v5, %v2632_v6  ;;  %v2568_v60 = vld [vmem:[#allocation2 + $0x178] sm:$0xf0]  ;;  %v3046_v0 = vld [vmem:[#allocation2 + $0x528] sm:$0xf] }
  0x84   :  { %1441 = vmatpush.bf16.msrb.mxu1 %v2423_v10  ;;  %v3110_v10 = vld [vmem:[#allocation2 + $0x5a8] sm:$0xf]  ;;  %v2520_v49 = vld [vmem:[#allocation2 + $0x118] sm:$0xf0] }
  0x85   :  { %1479 = vmatpush.bf16.msra.mxu2 %v2823_v9  ;;  %v3639_v9 = vld [vmem:[#allocation2 + $0x4b4] sm:$0xf0]  ;;  %v3111_v19 = vor.u32 %v3671_v11, %v3110_v10  ;;  %v2902_v11 = vld [vmem:[#allocation2 + $0x408] sm:$0xf]  ;;  %v2856_v50 = vld [vmem:[#allocation2 + $0x3b8] sm:$0xf0] }
  0x86   :  { %1454 = vmatpush.bf16.msrb.mxu3 %v2551_v15  ;;  %v2983_v15 = vor.u32 %v3639_v9, %v2982_v8  ;;  %v3529_v8 = vld [vmem:[#allocation2 + $0x14c] sm:$0xf]  ;;  %v2552_v9 = vld [vmem:[#allocation2 + $0x158] sm:$0xf0] }
  0x87   :  { %1467 = vmatpush.bf16.msra.mxu0 %v2679_v27 }
  0x88   :  { %1442 = vmatpush.bf16.msrb.mxu1 %v2407_v23  ;;  %v3667_v23 = vld [vmem:[#allocation2 + $0x594] sm:$0xf0] }
  0x89   :  { %1480 = vmatpush.bf16.msra.mxu2 %v2807_v21  ;;  %v3635_v21 = vld [vmem:[#allocation2 + $0x494] sm:$0xf0]  ;;  %v3095_v32 = vor.u32 %v3667_v23, %v3094_v22  ;;  %v3489_v22 = vld [vmem:[#allocation2 + $0xc] sm:$0xf]  ;;  %v2392_v23 = vld [vmem:[#allocation2 + $0x18] sm:$0xf0] }
  0x8a   :  { %1455 = vmatpush.bf16.msrb.mxu3 %v2535_v28  ;;  %v2967_v27 = vor.u32 %v3635_v21, %v2966_v20  ;;  %v2456_v28 = vld [vmem:[#allocation2 + $0x98] sm:$0xf0]  ;;  %v2555_v20 = vor.u32 %v3529_v8, %v2552_v9  ;;  %v3633_v8 = vld [vmem:[#allocation2 + $0x48c] sm:$0xf] }
  0x8b   :  { %1468 = vmatpush.bf16.msra.mxu0 %v2663_v43  ;;  %v2459_v38 = vor.u32 %v3505_v25, %v2456_v28  ;;  %v3537_v43 = vld [vmem:[#allocation2 + $0x18c] sm:$0xf]  ;;  %v2968_v9 = vld [vmem:[#allocation2 + $0x498] sm:$0xf0] }
  0x8c   :  { %1443 = vmatpush.bf16.msrb.mxu1 %v2391_v41  ;;  %v2951_v41 = vor.u32 %v3631_v34, %v2950_v33  ;;  %v2587_v54 = vor.u32 %v3537_v43, %v2584_v44  ;;  %v3577_v28 = vld [vmem:[#allocation2 + $0x2cc] sm:$0xf]  ;;  %v2536_v33 = vld [vmem:[#allocation2 + $0x138] sm:$0xf0]  ;;  %v2395_v34 = vor.u32 %v3489_v22, %v2392_v23 }
  0x8d   :  { %1481 = vmatpush.bf16.msra.mxu2 %v2791_v37  ;;  %v3663_v37 = vld [vmem:[#allocation2 + $0x574] sm:$0xf0]  ;;  %v3573_v43 = vld [vmem:[#allocation2 + $0x2ac] sm:$0xf]  ;;  %v2728_v44 = vld [vmem:[#allocation2 + $0x2b8] sm:$0xf0] }
  0x8e   :  { %1456 = vmatpush.bf16.msrb.mxu3 %v2519_v47  ;;  %v3079_v46 = vor.u32 %v3663_v37, %v3078_v36  ;;  %v2934_v47 = vld [vmem:[#allocation2 + $0x448] sm:$0xf]  ;;  %v3609_v36 = vld [vmem:[#allocation2 + $0x3cc] sm:$0xf]  ;;  %v2872_v37 = vld [vmem:[#allocation2 + $0x3d8] sm:$0xf0] }
  0x8f   :  { %1444 = vmatmul.bf16.vlgmr.msrb.gmra.mxu1 %v3918_v55  ;;  %1469 = vmatpush.bf16.msra.mxu0 %v2647_v63  ;;  %v3623_v63 = vld [vmem:[#allocation2 + $0x434] sm:$0xf0] }
  0x90   :  { %1488 = vmatpush.bf16.msra.mxu1 %v3015_v48  ;;  %v3627_v48 = vld [vmem:[#allocation2 + $0x454] sm:$0xf0] }
  0x91   :  { %1482 = vmatpush.bf16.msra.mxu2 %v2775_v59  ;;  %1457 = vmatmul.bf16.vlgmr.msrb.gmra.mxu3 %v3927_v4  ;;  %v2935_v56 = vor.u32 %v3627_v48, %v2934_v47  ;;  %v3533_v59 = vld [vmem:[#allocation2 + $0x16c] sm:$0xf] }
  0x92   :  { %1501 = vmatpush.bf16.msra.mxu3 %v3143_v53  ;;  %1470 = vmatmul.bf16.vlgmr.msra.gmra.mxu0 %v3916_v51  ;;  %v3497_v53 = vld [vmem:[#allocation2 + $0x4c] sm:$0xf]  ;;  %v2571_v5 = vor.u32 %v3533_v59, %v2568_v60  ;;  %v2984_v60 = vld [vmem:[#allocation2 + $0x4b8] sm:$0xf0] }
  0x93   :  { %1521 = vmatpush.bf16.msrb.mxu0 %v3159_v3  ;;  %v2427_v2 = vor.u32 %v3497_v53, %v2424_v58  ;;  %v3493_v3 = vld [vmem:[#allocation2 + $0x2c] sm:$0xf]  ;;  %v3144_v53 = vld [vmem:[#allocation2 + $0x5f8] sm:$0xf0] }
  0x94   :  { %1489 = vmatpush.bf16.msra.mxu1 %v2999_v1  ;;  %1483 = vmatmul.bf16.vlgmr.msra.gmra.mxu2 %v3920_v57  ;;  %v3655_v1 = vld [vmem:[#allocation2 + $0x534] sm:$0xf0]  ;;  %v3605_v47 = vld [vmem:[#allocation2 + $0x3ac] sm:$0xf] }
  0x95   :  { %1527 = vmatpush.bf16.msrb.mxu2 %v2507_v62  ;;  %v2918_v62 = vld [vmem:[#allocation2 + $0x428] sm:$0xf]  ;;  %v3047_v10 = vor.u32 %v3655_v1, %v3046_v0  ;;  %v3521_v48 = vld [vmem:[#allocation2 + $0x10c] sm:$0xf]  ;;  %v2712_v0 = vld [vmem:[#allocation2 + $0x298] sm:$0xf0] }
  0x96   :  { %1502 = vmatpush.bf16.msra.mxu3 %v3127_v7  ;;  %v2919_v6 = vor.u32 %v3623_v63, %v2918_v62  ;;  %v2408_v7 = vld [vmem:[#allocation2 + $0x38] sm:$0xf0]  ;;  %v2523_v58 = vor.u32 %v3521_v48, %v2520_v49  ;;  %v3637_v59 = vld [vmem:[#allocation2 + $0x4ac] sm:$0xf] }
  0x97   :  { %1540 = vmatpush.bf16.msra.mxu0 %v2635_v14  ;;  %v3651_v14 = vld [vmem:[#allocation2 + $0x514] sm:$0xf0]  ;;  %v2411_v17 = vor.u32 %v3493_v3, %v2408_v7  ;;  %v3569_v63 = vld [vmem:[#allocation2 + $0x28c] sm:$0xf] }
  0x98   :  { %1490 = vmatpush.bf16.msra.mxu1 %v2983_v15  ;;  %v3581_v15 = vld [vmem:[#allocation2 + $0x2ec] sm:$0xf]  ;;  %v2715_v7 = vor.u32 %v3569_v63, %v2712_v0  ;;  %v3226_v0 = vld [vmem:[#allocation5 + $0x70] sm:$0xf] }
  0x99   :  { %1528 = vmatpush.bf16.msrb.mxu2 %v2491_v12  ;;  %v3619_v12 = vld [vmem:[#allocation2 + $0x414] sm:$0xf0]  ;;  %v2763_v25 = vor.u32 %v3581_v15, %v2760_v16  ;;  %v3601_v1 = vld [vmem:[#allocation2 + $0x38c] sm:$0xf]  ;;  %v2824_v15 = vld [vmem:[#allocation2 + $0x378] sm:$0xf0] }
  0x9a   :  { %1503 = vmatpush.bf16.msra.mxu3 %v3111_v19  ;;  %v2888_v19 = vld [vmem:[#allocation2 + $0x3f8] sm:$0xf0]  ;;  %v2903_v21 = vor.u32 %v3619_v12, %v2902_v11  ;;  %v3673_v3 = vld [vmem:[#allocation2 + $0x5cc] sm:$0xf] }
  0x9b   :  { %1541 = vmatpush.bf16.msra.mxu0 %v2619_v26  ;;  %v3645_v26 = vld [vmem:[#allocation2 + $0x4ec] sm:$0xf]  ;;  %v2891_v29 = vor.u32 %v3613_v18, %v2888_v19  ;;  %v2971_v18 = vor.u32 %v3633_v8, %v2968_v9  ;;  %v2904_v9 = vld [vmem:[#allocation2 + $0x418] sm:$0xf0] }
  0x9c   :  { %1491 = vmatpush.bf16.msra.mxu1 %v2967_v27  ;;  %v3016_v27 = vld [vmem:[#allocation2 + $0x4f8] sm:$0xf0]  ;;  %v3565_v12 = vld [vmem:[#allocation2 + $0x26c] sm:$0xf] }
  0x9d   :  { %1529 = vmatpush.bf16.msrb.mxu2 %v2475_v24  ;;  %v3031_v24 = vor.u32 %v3651_v14, %v3030_v13  ;;  %v3597_v13 = vld [vmem:[#allocation2 + $0x36c] sm:$0xf] }
  0x9e   :  { %1504 = vmatpush.bf16.msra.mxu3 %v3095_v32  ;;  %v3525_v32 = vld [vmem:[#allocation2 + $0x12c] sm:$0xf]  ;;  %v2827_v22 = vor.u32 %v3597_v13, %v2824_v15 }
  0x9f   :  { %1542 = vmatpush.bf16.msra.mxu0 %v2603_v40  ;;  %v2747_v40 = vor.u32 %v3577_v28, %v2744_v31  ;;  %v3669_v16 = vld [vmem:[#allocation2 + $0x5ac] sm:$0xf]  ;;  %v2808_v28 = vld [vmem:[#allocation2 + $0x358] sm:$0xf0] }
  0xa0   :  { %1492 = vmatpush.bf16.msra.mxu1 %v2951_v41  ;;  %v2539_v41 = vor.u32 %v3525_v32, %v2536_v33  ;;  %v3096_v31 = vld [vmem:[#allocation2 + $0x598] sm:$0xf0]  ;;  %v3617_v8 = vld [vmem:[#allocation2 + $0x40c] sm:$0xf] }
  0xa1   :  { %1530 = vmatpush.bf16.msrb.mxu2 %v2459_v38  ;;  %v3019_v38 = vor.u32 %v3645_v26, %v3016_v27  ;;  %v3593_v26 = vld [vmem:[#allocation2 + $0x34c] sm:$0xf] }
  0xa2   :  { %1505 = vmatpush.bf16.msra.mxu3 %v3079_v46  ;;  %3166 = vmatmul.msk.bf16.vlgmr.msrb.gmra.mxu0 %vm1250_vm0, %v3934_v45  ;;  %v2875_v46 = vor.u32 %v3609_v36, %v2872_v37  ;;  %v2936_v36 = vld [vmem:[#allocation2 + $0x458] sm:$0xf0]  ;;  %v3653_v15 = vld [vmem:[#allocation2 + $0x52c] sm:$0xf] }
  0xa3   :  { %1543 = vmatpush.bf16.msra.mxu0 %v2587_v54  ;;  %v3003_v54 = vor.u32 %v3641_v39, %v3000_v42  ;;  %v3589_v42 = vld [vmem:[#allocation2 + $0x32c] sm:$0xf] }
  0xa4   :  { %1493 = vmatpush.bf16.msra.mxu1 %v2935_v56  ;;  %v2731_v56 = vor.u32 %v3573_v43, %v2728_v44  ;;  %v2792_v43 = vld [vmem:[#allocation2 + $0x338] sm:$0xf0]  ;;  %v3661_v44 = vld [vmem:[#allocation2 + $0x56c] sm:$0xf] }
  0xa5   :  { %1531 = vmatpush.bf16.msrb.mxu2 %v2443_v52  ;;  %v3677_v52 = vld [vmem:[#allocation2 + $0x5ec] sm:$0xf] }
  0xa6   :  { %1506 = vmatpush.bf16.msra.mxu3 %v3063_v61  ;;  %v2859_v61 = vor.u32 %v3605_v47, %v2856_v50  ;;  %v3147_v62 = vor.u32 %v3677_v52, %v3144_v53  ;;  %v3621_v50 = vld [vmem:[#allocation2 + $0x42c] sm:$0xf]  ;;  %v2920_v52 = vld [vmem:[#allocation2 + $0x438] sm:$0xf0] }
  0xa7   :  { %1544 = vmatpush.bf16.msra.mxu0 %v2571_v5  ;;  %v3128_v5 = vld [vmem:[#allocation2 + $0x5d8] sm:$0xf0]  ;;  %v3553_v53 = vld [vmem:[#allocation2 + $0x20c] sm:$0xf] }
  0xa8   :  { %1494 = vmatpush.bf16.msra.mxu1 %v2919_v6  ;;  %v2987_v6 = vor.u32 %v3637_v59, %v2984_v60  ;;  %v3131_v11 = vor.u32 %v3673_v3, %v3128_v5  ;;  %v3585_v59 = vld [vmem:[#allocation2 + $0x30c] sm:$0xf]  ;;  %v2776_v60 = vld [vmem:[#allocation2 + $0x318] sm:$0xf0]  ;;  %v3290_v3 = vld [vmem:[#allocation5 + $0xf0] sm:$0xf] }
  0xa9   :  { %1532 = vmatpush.bf16.msrb.mxu2 %v2427_v2  ;;  %v2840_v2 = vld [vmem:[#allocation2 + $0x398] sm:$0xf0]  ;;  %v3715_v5 = vld [vmem:[#allocation5 + $0xf4] sm:$0xf0] }
  0xaa   :  { %1507 = vmatpush.bf16.msra.mxu3 %v3047_v10  ;;  %v2843_v10 = vor.u32 %v3601_v1, %v2840_v2  ;;  %v2923_v1 = vor.u32 %v3621_v50, %v2920_v52  ;;  %v3699_v2 = vld [vmem:[#allocation5 + $0x74] sm:$0xf0]  ;;  %v3258_v52 = vld [vmem:[#allocation5 + $0xb0] sm:$0xf] }
  0xab   :  { %1545 = vmatpush.bf16.msra.mxu0 %v2555_v20  ;;  %v3967_v14 = vpop.f32.mrf.mxu0  ;;  %v3629_v20 = vld [vmem:[#allocation2 + $0x46c] sm:$0xf] }
  0xac   :  { %1495 = vmatpush.bf16.msra.mxu1 %v2903_v21  ;;  %v2952_v21 = vld [vmem:[#allocation2 + $0x478] sm:$0xf0] }
  0xad   :  { %1533 = vmatpush.bf16.msrb.mxu2 %v2411_v17  ;;  %v3112_v17 = vld [vmem:[#allocation2 + $0x5b8] sm:$0xf0]  ;;  %v2955_v32 = vor.u32 %v3629_v20, %v2952_v21  ;;  %v3218_v20 = vld [vmem:[#allocation5 + $0x60] sm:$0xf]  ;;  %v3697_v21 = vld [vmem:[#allocation5 + $0x64] sm:$0xf0] }
  0xae   :  { %1508 = vmatpush.bf16.msra.mxu3 %v3031_v24  ;;  %v3115_v23 = vor.u32 %v3669_v16, %v3112_v17  ;;  %v3561_v24 = vld [vmem:[#allocation2 + $0x24c] sm:$0xf]  ;;  %v3048_v16 = vld [vmem:[#allocation2 + $0x538] sm:$0xf0]  ;;  %v3227_v17 = vor.u32 %v3699_v2, %v3226_v0  ;;  %v3178_v2 = vld [vmem:[#allocation5 + $0x10] sm:$0xf] }
  0xaf   :  { %1496 = vmatmul.bf16.vlgmr.msra.gmra.mxu1 %v3944_v30  ;;  %1546 = vmatpush.bf16.msra.mxu0 %v2539_v41  ;;  %v2664_v41 = vld [vmem:[#allocation2 + $0x238] sm:$0xf0] }
  0xb0   :  { %1553 = vmatpush.bf16.msrb.mxu1 %v2763_v25  ;;  %v2680_v25 = vld [vmem:[#allocation2 + $0x258] sm:$0xf0] }
  0xb1   :  { %1534 = vmatpush.bf16.msrb.mxu2 %v2395_v34  ;;  %1509 = vmatmul.bf16.vlgmr.msra.gmra.mxu3 %v3946_v35  ;;  %v2683_v33 = vor.u32 %v3561_v24, %v2680_v25  ;;  %v3625_v34 = vld [vmem:[#allocation2 + $0x44c] sm:$0xf]  ;;  %v3713_v24 = vld [vmem:[#allocation5 + $0xe4] sm:$0xf0]  ;;  %v3051_v25 = vor.u32 %v3653_v15, %v3048_v16  ;;  %v3698_v15 = vld [vmem:[#allocation5 + $0x74] sm:$0xf] }
  0xb2   :  { %1566 = vmatpush.bf16.msrb.mxu3 %v2891_v29  ;;  %v3970_v27 = vpop.f32.mrf.mxu1  ;;  %v3665_v29 = vld [vmem:[#allocation2 + $0x58c] sm:$0xf]  ;;  %v2939_v48 = vor.u32 %v3625_v34, %v2936_v36  ;;  %v3274_v36 = vld [vmem:[#allocation5 + $0xd0] sm:$0xf]  ;;  %v3228_v16 = vld [vmem:[#allocation5 + $0x78] sm:$0xf0] }
  0xb3   :  { %1547 = vmatpush.bf16.msra.mxu0 %v2523_v58  ;;  %v3099_v39 = vor.u32 %v3665_v29, %v3096_v31  ;;  %v1265_v47 = vpop.f32.mrf.mxu0  ;;  %v2648_v58 = vld [vmem:[#allocation2 + $0x218] sm:$0xf0]  ;;  %v3219_v29 = vor.u32 %v3697_v21, %v3218_v20 }
  0xb4   :  { %1554 = vmatpush.bf16.msrb.mxu1 %v2747_v40  ;;  %1535 = vmatmul.bf16.vlgmr.msrb.gmra.mxu2 %v3918_v55  ;;  %v2696_v55 = vld [vmem:[#allocation2 + $0x278] sm:$0xf0]  ;;  %v3557_v40 = vld [vmem:[#allocation2 + $0x22c] sm:$0xf] }
  0xb5   :  { %1579 = vmatpush.bf16.msra.mxu2 %v3019_v38  ;;  %v2699_v19 = vor.u32 %v3565_v12, %v2696_v55  ;;  %v2811_v38 = vor.u32 %v3593_v26, %v2808_v28  ;;  %v2667_v49 = vor.u32 %v3557_v40, %v2664_v41  ;;  %v3681_v12 = vld [vmem:[#allocation2 + $0x60c] sm:$0xf]  ;;  %v3160_v55 = vld [vmem:[#allocation2 + $0x618] sm:$0xf0] }
  0xb6   :  { %1567 = vmatpush.bf16.msrb.mxu3 %v2875_v46  ;;  %1548 = vmatmul.bf16.vlgmr.msra.gmra.mxu0 %v3927_v4  ;;  %v3972_v4 = vpop.f32.mrf.mxu2  ;;  %v3974_v37 = vpop.f32.mrf.mxu3  ;;  %v3080_v46 = vld [vmem:[#allocation2 + $0x578] sm:$0xf0]  ;;  %v3649_v26 = vld [vmem:[#allocation2 + $0x50c] sm:$0xf] }
  0xb7   :  { %1592 = vmatpush.bf16.msrb.mxu0 %v3147_v62  ;;  %v3064_v62 = vld [vmem:[#allocation2 + $0x558] sm:$0xf0] }
  0xb8   :  { %1555 = vmatpush.bf16.msrb.mxu1 %v2731_v56  ;;  %v3083_v56 = vor.u32 %v3661_v44, %v3080_v46  ;;  %v3032_v28 = vld [vmem:[#allocation2 + $0x518] sm:$0xf0]  ;;  %v3709_v44 = vld [vmem:[#allocation5 + $0xc4] sm:$0xf0] }
  0xb9   :  { %1580 = vmatpush.bf16.msra.mxu2 %v3003_v54  ;;  %v2795_v54 = vor.u32 %v3589_v42, %v2792_v43  ;;  %v3693_v42 = vld [vmem:[#allocation5 + $0x44] sm:$0xf0]  ;;  %v3266_v43 = vld [vmem:[#allocation5 + $0xc0] sm:$0xf] }
  0xba   :  { %1568 = vmatpush.bf16.msrb.mxu3 %v2859_v61  ;;  %v3657_v61 = vld [vmem:[#allocation2 + $0x54c] sm:$0xf]  ;;  %v1278_v63 = vpop.f32.mrf.mxu1  ;;  %v3267_v47 = vor.u32 %v3709_v44, %v3266_v43 }
  0xbb   :  { %1593 = vmatpush.bf16.msrb.mxu0 %v3131_v11  ;;  %v3067_v11 = vor.u32 %v3657_v61, %v3064_v62  ;;  %v3705_v61 = vld [vmem:[#allocation5 + $0xa4] sm:$0xf0]  ;;  %v1620_v63 = vld [vmem:[%s4078_s2] sm:$0xf]  ;;  %v3268_v43 = vld [vmem:[#allocation5 + $0xc8] sm:$0xf0] }
  0xbc   :  { %1556 = vmatpush.bf16.msrb.mxu1 %v2715_v7  ;;  %v2651_v7 = vor.u32 %v3553_v53, %v2648_v58  ;;  %v3707_v53 = vld [vmem:[#allocation5 + $0xb4] sm:$0xf0]  ;;  %v3186_v58 = vld [vmem:[#allocation5 + $0x20] sm:$0xf]  ;;  %1622 = vst [vmem:[#allocation1] ss:$9 sm:$0xff] %v1620_v63 }
  0xbd   :  { %1581 = vmatpush.bf16.msra.mxu2 %v2987_v6 }
  0xbe   :  { %1569 = vmatpush.bf16.msrb.mxu3 %v2843_v10  ;;  %v1291_v6 = vpop.f32.mrf.mxu2  ;;  %v2779_v10 = vor.u32 %v3585_v59, %v2776_v60  ;;  %v1304_v13 = vpop.f32.mrf.mxu3  ;;  %v3689_v59 = vld [vmem:[#allocation5 + $0x24] sm:$0xf0]  ;;  %v3250_v60 = vld [vmem:[#allocation5 + $0xa0] sm:$0xf] }
  0xbf   :  { %1594 = vmatpush.bf16.msrb.mxu0 %v3115_v23  ;;  %v3282_v23 = vld [vmem:[#allocation5 + $0xe0] sm:$0xf]  ;;  %v3187_v62 = vor.u32 %v3689_v59, %v3186_v58  ;;  %v3242_v6 = vld [vmem:[#allocation5 + $0x90] sm:$0xf]  ;;  %v3701_v13 = vld [vmem:[#allocation5 + $0x84] sm:$0xf0] }
  0xc0   :  { %1557 = vmatpush.bf16.msrb.mxu1 %v2699_v19  ;;  %v2907_v19 = vor.u32 %v3617_v8, %v2904_v9  ;;  %v3283_v31 = vor.u32 %v3713_v24, %v3282_v23  ;;  %v3220_v24 = vld [vmem:[#allocation5 + $0x68] sm:$0xf0] }
  0xc1   :  { %1582 = vmatpush.bf16.msra.mxu2 %v2971_v18  ;;  %v3291_v18 = vor.u32 %v3715_v5, %v3290_v3  ;;  %v3687_v3 = vld [vmem:[#allocation5 + $0x14] sm:$0xf0] }
  0xc2   :  { %1570 = vmatpush.bf16.msrb.mxu3 %v2827_v22  ;;  %v3163_v22 = vor.u32 %v3681_v12, %v3160_v55  ;;  %v3179_v9 = vor.u32 %v3687_v3, %v3178_v2  ;;  %v3685_v12 = vld [vmem:[#allocation5 + $0x4] sm:$0xf0]  ;;  %v3234_v55 = vld [vmem:[#allocation5 + $0x80] sm:$0xf] }
  0xc3   :  { %1595 = vmatpush.bf16.msrb.mxu0 %v3099_v39  ;;  %v3035_v39 = vor.u32 %v3649_v26, %v3032_v28  ;;  %v3235_v21 = vor.u32 %v3701_v13, %v3234_v55  ;;  %v3712_v26 = vld [vmem:[#allocation5 + $0xe4] sm:$0xf]  ;;  %v3284_v28 = vld [vmem:[#allocation5 + $0xe8] sm:$0xf0]  ;;  %v1623_v3 = vld [vmem:[#allocation1] sm:$0xff] }
  0xc4   :  { %1558 = vmatpush.bf16.msrb.mxu1 %v2683_v33  ;;  %v3695_v33 = vld [vmem:[#allocation5 + $0x54] sm:$0xf0] }
  0xc5   :  { %1583 = vmatpush.bf16.msra.mxu2 %v2955_v32  ;;  %v3210_v32 = vld [vmem:[#allocation5 + $0x50] sm:$0xf] }
  0xc6   :  { %1571 = vmatpush.bf16.msrb.mxu3 %v2811_v38  ;;  %v3978_v34 = vpop.f32.mrf.mxu2  ;;  %v3711_v38 = vld [vmem:[#allocation5 + $0xd4] sm:$0xf0]  ;;  %v3211_v40 = vor.u32 %v3695_v33, %v3210_v32  ;;  %v3694_v32 = vld [vmem:[#allocation5 + $0x54] sm:$0xf]  ;;  %v3212_v33 = vld [vmem:[#allocation5 + $0x58] sm:$0xf0] }
  0xc7   :  { %1596 = vmatpush.bf16.msrb.mxu0 %v3083_v56  ;;  %v3275_v41 = vor.u32 %v3711_v38, %v3274_v36  ;;  %v3259_v56 = vor.u32 %v3707_v53, %v3258_v52  ;;  %v3710_v36 = vld [vmem:[#allocation5 + $0xd4] sm:$0xf]  ;;  %v3276_v38 = vld [vmem:[#allocation5 + $0xd8] sm:$0xf0] }
  0xc8   :  { %1559 = vmatpush.bf16.msrb.mxu1 %v2667_v49  ;;  %v3691_v49 = vld [vmem:[#allocation5 + $0x34] sm:$0xf0]  ;;  %v3706_v53 = vld [vmem:[#allocation5 + $0xb4] sm:$0xf] }
  0xc9   :  { %1584 = vmatpush.bf16.msra.mxu2 %v2939_v48  ;;  %v3194_v48 = vld [vmem:[#allocation5 + $0x30] sm:$0xf] }
  0xca   :  { %1572 = vmatpush.bf16.msrb.mxu3 %v2795_v54  ;;  %v3195_v54 = vor.u32 %v3691_v49, %v3194_v48  ;;  %v3690_v49 = vld [vmem:[#allocation5 + $0x34] sm:$0xf] }
  0xcb   :  { %1597 = vmatpush.bf16.msrb.mxu0 %v3067_v11  ;;  %v3981_v46 = vpop.f32.mrf.mxu0  ;;  %v3170_v11 = vld [vmem:[#allocation5] sm:$0xf] }
  0xcc   :  { %1560 = vmatpush.bf16.msrb.mxu1 %v2651_v7  ;;  %v3983_v50 = vpop.f32.mrf.mxu1  ;;  %v3703_v7 = vld [vmem:[#allocation5 + $0x94] sm:$0xf0] }
  0xcd   :  { %1585 = vmatpush.bf16.msra.mxu2 %v2923_v1 }
  0xce   :  { %1573 = vmatpush.bf16.msrb.mxu3 %v2779_v10  ;;  %v3243_v10 = vor.u32 %v3703_v7, %v3242_v6  ;;  %v3686_v6 = vld [vmem:[#allocation5 + $0x14] sm:$0xf]  ;;  %v3180_v7 = vld [vmem:[#allocation5 + $0x18] sm:$0xf0] }
  0xcf   :  { %1561 = vmatmul.bf16.vlgmr.msrb.gmra.mxu1 %v3916_v51  ;;  %1598 = vmatpush.bf16.msrb.mxu0 %v3051_v25  ;;  %v3202_v51 = vld [vmem:[#allocation5 + $0x40] sm:$0xf]  ;;  %v3183_v13 = vor.u32 %v3686_v6, %v3180_v7  ;;  %v3338_v7 = vld [vmem:[#allocation5 + $0x150] sm:$0xf] }
  0xd0   :  { %2062 = vmatpush.bf16.msra.mxu1 %v3291_v18  ;;  %v3292_v18 = vld [vmem:[#allocation5 + $0xf8] sm:$0xf0] }
  0xd1   :  { %1586 = vmatpush.bf16.msra.mxu2 %v2907_v19  ;;  %1574 = vmatmul.bf16.vlgmr.msrb.gmra.mxu3 %v3920_v57  ;;  %v3203_v57 = vor.u32 %v3693_v42, %v3202_v51  ;;  %v3171_v19 = vor.u32 %v3685_v12, %v3170_v11  ;;  %v3204_v51 = vld [vmem:[#allocation5 + $0x48] sm:$0xf0]  ;;  %v3708_v42 = vld [vmem:[#allocation5 + $0xc4] sm:$0xf] }
  0xd2   :  { %2049 = vmatpush.bf16.msra.mxu3 %v3227_v17  ;;  %v3714_v17 = vld [vmem:[#allocation5 + $0xf4] sm:$0xf]  ;;  %v3271_v48 = vor.u32 %v3708_v42, %v3268_v43 }
  0xd3   :  { %1599 = vmatpush.bf16.msrb.mxu0 %v3035_v39  ;;  %v1317_v0 = vpop.f32.mrf.mxu0  ;;  %v3295_v23 = vor.u32 %v3714_v17, %v3292_v18  ;;  %v3215_v39 = vor.u32 %v3694_v32, %v3212_v33  ;;  %v3684_v17 = vld [vmem:[#allocation5 + $0x4] sm:$0xf]  ;;  %v3172_v18 = vld [vmem:[#allocation5 + $0x8] sm:$0xf0] }
  0xd4   :  { %1587 = vmatmul.bf16.vlgmr.msra.gmra.mxu2 %v3944_v30  ;;  %2063 = vmatpush.bf16.msra.mxu1 %v3283_v31  ;;  %v1343_v30 = vpop.f32.mrf.mxu2  ;;  %v1354_v1 = vpop.f32.mrf.mxu3  ;;  %v3287_v31 = vor.u32 %v3712_v26, %v3284_v28  ;;  %v3704_v0 = vld [vmem:[#allocation5 + $0xa4] sm:$0xf] }
  0xd5   :  { %1612 = vmatpush.bf16.msrb.mxu2 %v3163_v22  ;;  %v1330_v5 = vpop.f32.mrf.mxu1  ;;  %v3231_v22 = vor.u32 %v3698_v15, %v3228_v16  ;;  %v3196_v30 = vld [vmem:[#allocation5 + $0x38] sm:$0xf0]  ;;  %v1627_v15 = vpack.i.b16 %v1623_v3, %v1623_v3 }
  0xd6   :  { %2050 = vmatpush.bf16.msra.mxu3 %v3219_v29  ;;  %1600 = vmatmul.bf16.vlgmr.msrb.gmra.mxu0 %v3946_v35  ;;  %v3251_v35 = vor.u32 %v3705_v61, %v3250_v60  ;;  %v3199_v58 = vor.u32 %v3690_v49, %v3196_v30  ;;  %v3688_v61 = vld [vmem:[#allocation5 + $0x24] sm:$0xf] }
  0xd8   :  { %2064 = vmatpush.bf16.msra.mxu1 %v3275_v41  ;;  %v3692_v41 = vld [vmem:[#allocation5 + $0x44] sm:$0xf] }
  0xda   :  { %2051 = vmatpush.bf16.msra.mxu3 %v3211_v40  ;;  %v3279_v40 = vor.u32 %v3710_v36, %v3276_v38 }
  0xdc   :  { %2065 = vmatpush.bf16.msra.mxu1 %v3267_v47  ;;  %v1367_v8 = vpop.f32.mrf.mxu2  ;;  %v1356_v20 = vpop.f32.mrf.mxu3  ;;  %v1277_v47 = vadd.f32 %v3970_v27, %v3967_v14 }
  0xdd   :  { %v1368_v44 = vadd.f32 %v1367_v8, %v1354_v1  ;;  %v3252_v1 = vld [vmem:[#allocation5 + $0xa8] sm:$0xf0]  ;;  %v3700_v20 = vld [vmem:[#allocation5 + $0x84] sm:$0xf] }
  0xde   :  { %2052 = vmatpush.bf16.msra.mxu3 %v3203_v57  ;;  %v3207_v57 = vor.u32 %v3692_v41, %v3204_v51  ;;  %v1290_v59 = vadd.f32 %v3972_v4, %v1277_v47  ;;  %v3255_v5 = vor.u32 %v3704_v0, %v3252_v1  ;;  %v1624_v4 = vld [vmem:[#allocation1 + $0x9] sm:$0xff] }
  0xdf   :  { %v1630_v16 = vpack.i.b16 %v1624_v4, %v1624_v4  ;;  %v3729_v0 = vld [vmem:[#allocation5 + $0x164] sm:$0xf0]  ;;  %v3402_v4 = vld [vmem:[#allocation5 + $0x1d0] sm:$0xf] }
  0xe0   :  { %2066 = vmatpush.bf16.msra.mxu1 %v3259_v56 }
  0xe2   :  { %2053 = vmatpush.bf16.msra.mxu3 %v3195_v54  ;;  %v3260_v54 = vld [vmem:[#allocation5 + $0xb8] sm:$0xf0] }
  0xe3   :  { %v3263_v60 = vor.u32 %v3706_v53, %v3260_v54 }
  0xe4   :  { %3167 = vmatmul.msk.bf16.vlgmr.msrb.gmra.mxu2 %vm1250_vm0, %v3934_v45  ;;  %2067 = vmatpush.bf16.msra.mxu1 %v3251_v35  ;;  %v3696_v45 = vld [vmem:[#allocation5 + $0x64] sm:$0xf]  ;;  %v1369_v25 = vpop.f32.mrf.mxu2  ;;  %v1303_v35 = vadd.f32 %v3974_v37, %v1290_v59  ;;  %v3418_v59 = vld [vmem:[#allocation5 + $0x1f0] sm:$0xf] }
  0xe5   :  { %v3223_v29 = vor.u32 %v3696_v45, %v3220_v24  ;;  %v3175_v45 = vor.u32 %v3684_v17, %v3172_v18  ;;  %v1629_v24 = vperm.slane %v1627_v15, 0  ;;  %v3725_v15 = vld [vmem:[#allocation5 + $0x144] sm:$0xf0] }
  0xe6   :  { %2054 = vmatpush.bf16.msra.mxu3 %v3187_v62  ;;  %v3188_v62 = vld [vmem:[#allocation5 + $0x28] sm:$0xf0]  ;;  %v1316_v11 = vadd.f32 %v3981_v46, %v1303_v35  ;;  %v1632_v46 = vperm.slane %v1630_v16, 0  ;;  %v3394_v16 = vld [vmem:[#allocation5 + $0x1c0] sm:$0xf] }
  0xe7   :  { %v3191_v27 = vor.u32 %v3688_v61, %v3188_v62  ;;  %v1643_v36 = vunpack.c.l.bf16 %v1629_v24  ;;  %v3747_v62 = vld [vmem:[#allocation5 + $0x1f4] sm:$0xf0]  ;;  %v3741_v17 = vld [vmem:[#allocation5 + $0x1c4] sm:$0xf0] }
  0xe8   :  { %2068 = vmatpush.bf16.msra.mxu1 %v3243_v10  ;;  %v3244_v10 = vld [vmem:[#allocation5 + $0x98] sm:$0xf0]  ;;  %v1644_v38 = vunpack.c.l.bf16 %v1632_v46  ;;  %v3419_v1 = vor.u32 %v3747_v62, %v3418_v59  ;;  %v3395_v18 = vor.u32 %v3741_v17, %v3394_v16  ;;  %v3348_v62 = vld [vmem:[#allocation5 + $0x168] sm:$0xf0]  ;;  %v3722_v17 = vld [vmem:[#allocation5 + $0x134] sm:$0xf] }
  0xe9   :  { %v3396_v16 = vld [vmem:[#allocation5 + $0x1c8] sm:$0xf0] }
  0xea   :  { %2055 = vmatpush.bf16.msra.mxu3 %v3179_v9  ;;  %v3702_v9 = vld [vmem:[#allocation5 + $0x94] sm:$0xf]  ;;  %2088 = vmatpush.bf16.msra.mxu0 %v3419_v1  ;;  %v3412_v1 = vld [vmem:[#allocation5 + $0x1e8] sm:$0xf0] }
  0xeb   :  { %v1380_v52 = vpop.f32.mrf.mxu0  ;;  %v3247_v37 = vor.u32 %v3702_v9, %v3244_v10  ;;  %v3743_v10 = vld [vmem:[#allocation5 + $0x1d4] sm:$0xf0] }
  0xec   :  { %2069 = vmatpush.bf16.msra.mxu1 %v3235_v21  ;;  %v1381_v56 = vadd.f32 %v1380_v52, %v1368_v44  ;;  %v1393_v63 = vpop.f32.mrf.mxu1  ;;  %v3236_v21 = vld [vmem:[#allocation5 + $0x88] sm:$0xf0] }
  0xed   :  { %v3239_v26 = vor.u32 %v3700_v20, %v3236_v21  ;;  %v3723_v20 = vld [vmem:[#allocation5 + $0x134] sm:$0xf0]  ;;  %v3386_v21 = vld [vmem:[#allocation5 + $0x1b0] sm:$0xf] }
  0xee   :  { %2056 = vmatpush.bf16.msra.mxu3 %v3171_v19  ;;  %v1394_v14 = vadd.f32 %v1393_v63, %v1381_v56  ;;  %v3354_v56 = vld [vmem:[#allocation5 + $0x170] sm:$0xf]  ;;  %v3346_v63 = vld [vmem:[#allocation5 + $0x160] sm:$0xf] }
  0xf0   :  { %2114 = vmatpush.bf16.msrb.mxu1 %v3295_v23 }
  0xf2   :  { %2101 = vmatpush.bf16.msrb.mxu3 %v3231_v22  ;;  %v1329_v22 = vadd.f32 %v3983_v50, %v1316_v11 }
  0xf3   :  { %v1382_v8 = vpop.f32.mrf.mxu0 }
  0xf4   :  { %2115 = vmatpush.bf16.msrb.mxu1 %v3287_v31  ;;  %v1406_v2 = vpop.f32.mrf.mxu3  ;;  %v1395_v19 = vpop.f32.mrf.mxu1  ;;  %v3727_v8 = vld [vmem:[#allocation5 + $0x154] sm:$0xf0] }
  0xf5   :  { %v1407_v12 = vadd.f32 %v1406_v2, %v1394_v14  ;;  %v3410_v14 = vld [vmem:[#allocation5 + $0x1e0] sm:$0xf]  ;;  %v3347_v2 = vor.u32 %v3729_v0, %v3346_v63  ;;  %v3339_v9 = vor.u32 %v3727_v8, %v3338_v7  ;;  %v3322_v19 = vld [vmem:[#allocation5 + $0x130] sm:$0xf]  ;;  %v3744_v63 = vld [vmem:[#allocation5 + $0x1e4] sm:$0xf] }
  0xf6   :  { %2102 = vmatpush.bf16.msrb.mxu3 %v3223_v29  ;;  %v1342_v29 = vadd.f32 %v3978_v34, %v1329_v22  ;;  %v3323_v22 = vor.u32 %v3723_v20, %v3322_v19  ;;  %v3738_v19 = vld [vmem:[#allocation5 + $0x1b4] sm:$0xf] }
  0xf7   :  { %v1419_v55 = vpop.f32.mrf.mxu2 }
  0xf8   :  { %2116 = vmatpush.bf16.msrb.mxu1 %v3279_v40  ;;  %v1420_v23 = vadd.f32 %v1419_v55, %v1407_v12  ;;  %v3403_v12 = vor.u32 %v3743_v10, %v3402_v4  ;;  %v1625_v4 = vld [vmem:[#allocation1 + $0x12] sm:$0xff] }
  0xf9   :  { %v3332_v10 = vld [vmem:[#allocation5 + $0x148] sm:$0xf0] }
  0xfa   :  { %2103 = vmatpush.bf16.msrb.mxu3 %v3215_v39 }
  0xfb   :  { %v1432_v28 = vpop.f32.mrf.mxu0 }
  0xfc   :  { %2117 = vmatpush.bf16.msrb.mxu1 %v3271_v48  ;;  %v1408_v25 = vpop.f32.mrf.mxu3  ;;  %v1433_v31 = vadd.f32 %v1432_v28, %v1420_v23  ;;  %v3739_v23 = vld [vmem:[#allocation5 + $0x1b4] sm:$0xf0]  ;;  %v3314_v28 = vld [vmem:[#allocation5 + $0x120] sm:$0xf] }
  0xfd   :  { %v3387_v24 = vor.u32 %v3739_v23, %v3386_v21  ;;  %v3388_v21 = vld [vmem:[#allocation5 + $0x1b8] sm:$0xf0]  ;;  %v3316_v23 = vld [vmem:[#allocation5 + $0x128] sm:$0xf0] }
  0xfe   :  { %2104 = vmatpush.bf16.msrb.mxu3 %v3207_v57  ;;  %v1618_v33 = vpack.c.bf16 %v1433_v31, %v1342_v29  ;;  %v3721_v29 = vld [vmem:[#allocation5 + $0x124] sm:$0xf0]  ;;  %v3378_v31 = vld [vmem:[#allocation5 + $0x1a0] sm:$0xf] }
  0xff   :  { %v1421_v32 = vpop.f32.mrf.mxu2 }
 0x100   :  { %2118 = vmatpush.bf16.msrb.mxu1 %v3263_v60  ;;  %v1639_v39 = vunpack.c.l.bf16 %v1618_v33  ;;  %v1640_v50 = vunpack.c.h.bf16 %v1618_v33  ;;  %v3315_v32 = vor.u32 %v3721_v29, %v3314_v28  ;;  %v3737_v33 = vld [vmem:[#allocation5 + $0x1a4] sm:$0xf0]  ;;  %v3736_v28 = vld [vmem:[#allocation5 + $0x1a4] sm:$0xf]  ;;  %v3380_v29 = vld [vmem:[#allocation5 + $0x1a8] sm:$0xf0] }
 0x102   :  { %2105 = vmatpush.bf16.msrb.mxu3 %v3199_v58  ;;  %v1647_v40 = vadd.f32 %v1643_v36, %v1639_v39  ;;  %v1648_v41 = vadd.f32 %v1644_v38, %v1640_v50  ;;  %v3731_v58 = vld [vmem:[#allocation5 + $0x174] sm:$0xf0]  ;;  %v3379_v36 = vor.u32 %v3737_v33, %v3378_v31  ;;  %v3306_v38 = vld [vmem:[#allocation5 + $0x110] sm:$0xf] }
 0x103   :  { %v1434_v51 = vpop.f32.mrf.mxu0  ;;  %v3355_v61 = vor.u32 %v3731_v58, %v3354_v56  ;;  %v3719_v39 = vld [vmem:[#allocation5 + $0x114] sm:$0xf0]  ;;  %v3370_v50 = vld [vmem:[#allocation5 + $0x190] sm:$0xf] }
 0x104   :  { %2119 = vmatpush.bf16.msrb.mxu1 %v3255_v5  ;;  %v1657_v42 = vmax.f32 %v1647_v40, 0.0  ;;  %v1658_v43 = vmax.f32 %v1648_v41, 0.0  ;;  %v3307_v40 = vor.u32 %v3719_v39, %v3306_v38  ;;  %v3735_v41 = vld [vmem:[#allocation5 + $0x194] sm:$0xf0]  ;;  %v3298_v51 = vld [vmem:[#allocation5 + $0x100] sm:$0xf]  ;;  %v3383_v38 = vor.u32 %v3736_v28, %v3380_v29 }
 0x105   :  { %2075 = vmatpush.bf16.msra.mxu2 %v3355_v61  ;;  %v3728_v61 = vld [vmem:[#allocation5 + $0x164] sm:$0xf]  ;;  %v3718_v39 = vld [vmem:[#allocation5 + $0x114] sm:$0xf]  ;;  %v3752_v28 = vld [vmem:[%s4081_s5 + $0x20] sm:$0xff] }
 0x106   :  { %2106 = vmatpush.bf16.msrb.mxu3 %v3191_v27  ;;  %v1661_v44 = vpack.c.bf16 %v1657_v42, %v1657_v42  ;;  %v1662_v57 = vpack.c.bf16 %v1658_v43, %v1658_v43  ;;  %v3745_v27 = vld [vmem:[#allocation5 + $0x1e4] sm:$0xf0]  ;;  %v3351_v0 = vor.u32 %v3728_v61, %v3348_v62  ;;  %v3760_v29 = vld [vmem:[%s4081_s5 + $0x60] sm:$0xff] }
 0x107   :  { %v3411_v5 = vor.u32 %v3745_v27, %v3410_v14  ;;  %v3717_v42 = vld [vmem:[#allocation5 + $0x104] sm:$0xf0]  ;;  %v3415_v14 = vor.u32 %v3744_v63, %v3412_v1  ;;  %v3726_v27 = vld [vmem:[#allocation5 + $0x154] sm:$0xf] }
 0x108   :  { %2120 = vmatpush.bf16.msrb.mxu1 %v3247_v37  ;;  %2057 = vmatmul.bf16.vlgmr.msra.gmra.mxu3 %v1661_v44 }
 0x109   :  { %2070 = vmatmul.bf16.vlgmr.msra.gmra.mxu1 %v1662_v57  ;;  %2076 = vmatpush.bf16.msra.mxu2 %v3347_v2 }
 0x10a   :  { %2107 = vmatpush.bf16.msrb.mxu3 %v3183_v13  ;;  %2089 = vmatpush.bf16.msra.mxu0 %v3411_v5  ;;  %v3330_v13 = vld [vmem:[#allocation5 + $0x140] sm:$0xf]  ;;  %v3404_v5 = vld [vmem:[#allocation5 + $0x1d8] sm:$0xf0] }
 0x10b   :  { %v3331_v37 = vor.u32 %v3725_v15, %v3330_v13  ;;  %v2154_v13 = vld [vmem:[%s4080_s4] sm:$0x3] }
 0x10c   :  { %2121 = vmatpush.bf16.msrb.mxu1 %v3239_v26  ;;  %v1445_v47 = vpop.f32.mrf.mxu1 }
 0x10d   :  { %2077 = vmatpush.bf16.msra.mxu2 %v3339_v9  ;;  %v3724_v9 = vld [vmem:[#allocation5 + $0x144] sm:$0xf] }
 0x10e   :  { %2108 = vmatpush.bf16.msrb.mxu3 %v3175_v45  ;;  %2090 = vmatpush.bf16.msra.mxu0 %v3403_v12  ;;  %v1626_v12 = vld [vmem:[#allocation1 + $0x1b] sm:$0xff]  ;;  %v3335_v15 = vor.u32 %v3724_v9, %v3332_v10 }
 0x10f   :  { %v1471_v34 = vpop.f32.mrf.mxu0  ;;  %2156 = vst [vmem:[#allocation1] ss:$9 sm:$0xff] %v2154_v13 }
 0x111   :  { %2078 = vmatpush.bf16.msra.mxu2 %v3331_v37 }
 0x112   :  { %2091 = vmatpush.bf16.msra.mxu0 %v3395_v18  ;;  %v3324_v18 = vld [vmem:[#allocation5 + $0x138] sm:$0xf0] }
 0x113   :  { %v3327_v20 = vor.u32 %v3722_v17, %v3324_v18 }
 0x114   :  { %v1447_v48 = vpop.f32.mrf.mxu1  ;;  %v1458_v30 = vpop.f32.mrf.mxu3 }
 0x115   :  { %v1459_v52 = vadd.f32 %v1458_v30, %v1445_v47  ;;  %2079 = vmatpush.bf16.msra.mxu2 %v3323_v22  ;;  %v3733_v47 = vld [vmem:[#allocation5 + $0x184] sm:$0xf0]  ;;  %v3299_v48 = vor.u32 %v3717_v42, %v3298_v51  ;;  %v3746_v30 = vld [vmem:[#allocation5 + $0x1f4] sm:$0xf]  ;;  %v3720_v22 = vld [vmem:[#allocation5 + $0x124] sm:$0xf] }
 0x116   :  { %2092 = vmatpush.bf16.msra.mxu0 %v3387_v24 }
 0x117   :  { %v1484_v49 = vpop.f32.mrf.mxu2  ;;  %v1473_v53 = vpop.f32.mrf.mxu0  ;;  %v1472_v54 = vadd.f32 %v1471_v34, %v1459_v52  ;;  %v3730_v34 = vld [vmem:[#allocation5 + $0x174] sm:$0xf]  ;;  %v3420_v52 = vld [vmem:[#allocation5 + $0x1f8] sm:$0xf0] }
 0x118   :  { %2109 = vmatmul.bf16.vlgmr.msrb.gmra.mxu3 %v1661_v44  ;;  %v3371_v44 = vor.u32 %v3735_v41, %v3370_v50  ;;  %v3423_v59 = vor.u32 %v3746_v30, %v3420_v52  ;;  %v3308_v50 = vld [vmem:[#allocation5 + $0x118] sm:$0xf0] }
 0x119   :  { %v3998_v60 = vadd.f32 %v1484_v49, %v1472_v54  ;;  %2122 = vmatmul.bf16.vlgmr.msrb.gmra.mxu1 %v1662_v57  ;;  %2080 = vmatpush.bf16.msra.mxu2 %v3315_v32  ;;  %v3362_v57 = vld [vmem:[#allocation5 + $0x180] sm:$0xf]  ;;  %v3356_v49 = vld [vmem:[#allocation5 + $0x178] sm:$0xf0]  ;;  %v3319_v32 = vor.u32 %v3720_v22, %v3316_v23  ;;  %v3311_v42 = vor.u32 %v3718_v39, %v3308_v50  ;;  %v3754_v22 = vld [vmem:[%s4081_s5 + $0x30] sm:$0xff] }
 0x11a   :  { %2093 = vmatpush.bf16.msra.mxu0 %v3379_v36  ;;  %v3363_v56 = vor.u32 %v3733_v47, %v3362_v57  ;;  %v3359_v58 = vor.u32 %v3730_v34, %v3356_v49  ;;  %v3372_v41 = vld [vmem:[#allocation5 + $0x198] sm:$0xf0]  ;;  %v3300_v57 = vld [vmem:[#allocation5 + $0x108] sm:$0xf0]  ;;  %v3732_v34 = vld [vmem:[#allocation5 + $0x184] sm:$0xf] }
 0x11b   :  { %v3762_v23 = vld [vmem:[%s4081_s5 + $0x70] sm:$0xff]  ;;  %v3757_v39 = vld [vmem:[%s4081_s5 + $0x48] sm:$0xff]  ;;  %v3748_v50 = vld [vmem:[%s4081_s5] sm:$0xff] }
 0x11c   :  { %v1460_v3 = vpop.f32.mrf.mxu3 }
 0x11d   :  { %2081 = vmatpush.bf16.msra.mxu2 %v3307_v40  ;;  %v3742_v3 = vld [vmem:[#allocation5 + $0x1d4] sm:$0xf] }
 0x11e   :  { %2094 = vmatpush.bf16.msra.mxu0 %v3371_v44  ;;  %v3407_v7 = vor.u32 %v3742_v3, %v3404_v5  ;;  %v3734_v40 = vld [vmem:[#allocation5 + $0x194] sm:$0xf]  ;;  %v3716_v44 = vld [vmem:[#allocation5 + $0x104] sm:$0xf] }
 0x11f   :  { %v1486_v35 = vpop.f32.mrf.mxu2  ;;  %v4000_v6 = vpop.f32.mrf.mxu0  ;;  %v3303_v52 = vor.u32 %v3716_v44, %v3300_v57  ;;  %v2157_v57 = vld [vmem:[#allocation1] sm:$0xff] }
 0x120   :  { %v3340_v35 = vld [vmem:[#allocation5 + $0x158] sm:$0xf0] }
 0x121   :  { %2082 = vmatpush.bf16.msra.mxu2 %v3299_v48  ;;  %v3343_v2 = vor.u32 %v3726_v27, %v3340_v35  ;;  %v3364_v48 = vld [vmem:[#allocation5 + $0x188] sm:$0xf0] }
 0x122   :  { %2095 = vmatpush.bf16.msra.mxu0 %v3363_v56  ;;  %v3367_v56 = vor.u32 %v3732_v34, %v3364_v48  ;;  %v2159_v34 = vpack.i.b16 %v2157_v57, %v2157_v57 }
 0x125   :  { %2127 = vmatpush.bf16.msrb.mxu2 %v3359_v58  ;;  %v1633_v58 = vpack.i.b16 %v1625_v4, %v1625_v4 }
 0x126   :  { %2140 = vmatpush.bf16.msrb.mxu0 %v3423_v59  ;;  %v1636_v59 = vpack.i.b16 %v1626_v12, %v1626_v12 }
 0x127   :  { %v1525_v11 = vpop.f32.mrf.mxu0  ;;  %v1635_v63 = vperm.slane %v1633_v58, 0 }
 0x128   :  { %v3740_v11 = vld [vmem:[#allocation5 + $0x1c4] sm:$0xf] }
 0x129   :  { %2128 = vmatpush.bf16.msrb.mxu2 %v3351_v0  ;;  %v3399_v37 = vor.u32 %v3740_v11, %v3396_v16  ;;  %v1638_v0 = vperm.slane %v1636_v59, 0 }
 0x12a   :  { %2141 = vmatpush.bf16.msrb.mxu0 %v3415_v14 }
 0x12b   :  { %v1646_v3 = vunpack.c.l.bf16 %v1638_v0 }
 0x12c   :  { %v4002_v55 = vpop.f32.mrf.mxu1 }
 0x12d   :  { %2129 = vmatpush.bf16.msrb.mxu2 %v3343_v2  ;;  %v1645_v2 = vunpack.c.l.bf16 %v1635_v63 }
 0x12e   :  { %2142 = vmatpush.bf16.msrb.mxu0 %v3407_v7 }
 0x131   :  { %2130 = vmatpush.bf16.msrb.mxu2 %v3335_v15 }
 0x132   :  { %2143 = vmatpush.bf16.msrb.mxu0 %v3399_v37 }
 0x133   :  { %v4008_v26 = vpop.f32.mrf.mxu0 }
 0x134   :  { %v4004_v45 = vpop.f32.mrf.mxu3  ;;  %v1499_v46 = vpop.f32.mrf.mxu1 }
 0x135   :  { %v3391_v46 = vor.u32 %v3738_v19, %v3388_v21  ;;  %2131 = vmatpush.bf16.msrb.mxu2 %v3327_v20  ;;  %v3755_v20 = vld [vmem:[%s4081_s5 + $0x38] sm:$0xff] }
 0x136   :  { %v3763_v21 = vld [vmem:[%s4081_s5 + $0x78] sm:$0xff]  ;;  %2310 = vmatpush.bf16.msra.mxu3 %v3755_v20 }
 0x137   :  { %v4006_v25 = vpop.f32.mrf.mxu2  ;;  %2144 = vmatpush.bf16.msrb.mxu0 %v3391_v46  ;;  %2323 = vmatpush.bf16.msra.mxu1 %v3763_v21  ;;  %v3761_v46 = vld [vmem:[%s4081_s5 + $0x68] sm:$0xff] }
 0x138   :  { %v1550_v51 = vadd.f32 %v4008_v26, %v4006_v25  ;;  %v1498_v25 = vadd.f32 %v4002_v55, %v3998_v60 }
 0x139   :  { %2132 = vmatpush.bf16.msrb.mxu2 %v3319_v32  ;;  %v3759_v32 = vld [vmem:[%s4081_s5 + $0x58] sm:$0xff] }
 0x13a   :  { %v1511_v61 = vadd.f32 %v4004_v45, %v1498_v25  ;;  %2311 = vmatpush.bf16.msra.mxu3 %v3754_v22 }
 0x13b   :  { %v1551_v54 = vpop.f32.mrf.mxu0  ;;  %2145 = vmatpush.bf16.msrb.mxu0 %v3383_v38  ;;  %2324 = vmatpush.bf16.msra.mxu1 %v3762_v23  ;;  %v3749_v38 = vld [vmem:[%s4081_s5 + $0x8] sm:$0xff] }
 0x13c   :  { %v1512_v43 = vpop.f32.mrf.mxu3  ;;  %v1524_v14 = vadd.f32 %v4000_v6, %v1511_v61 }
 0x13d   :  { %v3375_v43 = vor.u32 %v3734_v40, %v3372_v41  ;;  %2133 = vmatpush.bf16.msrb.mxu2 %v3311_v42  ;;  %v3756_v40 = vld [vmem:[%s4081_s5 + $0x40] sm:$0xff] }
 0x13f   :  { %v1538_v53 = vpop.f32.mrf.mxu2  ;;  %2146 = vmatpush.bf16.msrb.mxu0 %v3375_v43  ;;  %2325 = vmatpush.bf16.msra.mxu1 %v3761_v46 }
 0x141   :  { %2134 = vmatpush.bf16.msrb.mxu2 %v3303_v52 }
 0x143   :  { %2147 = vmatpush.bf16.msrb.mxu0 %v3367_v56  ;;  %2326 = vmatpush.bf16.msra.mxu1 %v3760_v29 }
 0x147   :  { %2327 = vmatpush.bf16.msra.mxu1 %v3759_v32 }
 0x14c   :  { %v1562_v8 = vpop.f32.mrf.mxu1 }
 0x14d   :  { %v1563_v47 = vadd.f32 %v1562_v8, %v1550_v51 }
 0x153   :  { %v1601_v36 = vpop.f32.mrf.mxu0 }
 0x154   :  { %v1575_v24 = vpop.f32.mrf.mxu3  ;;  %v1564_v31 = vpop.f32.mrf.mxu1 }
 0x155   :  { %v1576_v30 = vadd.f32 %v1575_v24, %v1563_v47  ;;  %v3753_v24 = vld [vmem:[%s4081_s5 + $0x28] sm:$0xff]  ;;  %v3751_v31 = vld [vmem:[%s4081_s5 + $0x18] sm:$0xff] }
 0x156   :  { %2312 = vmatpush.bf16.msra.mxu3 %v3753_v24  ;;  %v2158_v47 = vld [vmem:[#allocation1 + $0x9] sm:$0xff] }
 0x157   :  { %v1588_v33 = vpop.f32.mrf.mxu2  ;;  %v2162_v48 = vpack.i.b16 %v2158_v47, %v2158_v47 }
 0x158   :  { %v1589_v26 = vadd.f32 %v1588_v33, %v1576_v30  ;;  %v3750_v33 = vld [vmem:[%s4081_s5 + $0x10] sm:$0xff] }
 0x15a   :  { %v1602_v62 = vadd.f32 %v1601_v36, %v1589_v26  ;;  %2313 = vmatpush.bf16.msra.mxu3 %v3752_v28  ;;  %v3758_v36 = vld [vmem:[%s4081_s5 + $0x50] sm:$0xff] }
 0x15b   :  { %v1603_v54 = vpop.f32.mrf.mxu0  ;;  %2328 = vmatpush.bf16.msra.mxu1 %v3758_v36 }
 0x15c   :  { %v1577_v49 = vpop.f32.mrf.mxu3  ;;  %v2164_v54 = vperm.slane %v2162_v48, 0 }
 0x15e   :  { %2314 = vmatpush.bf16.msra.mxu3 %v3751_v31  ;;  %v2168_v61 = vunpack.c.l.bf16 %v2164_v54 }
 0x15f   :  { %v1590_v53 = vpop.f32.mrf.mxu2  ;;  %2329 = vmatpush.bf16.msra.mxu1 %v3757_v39 }
 0x160   :  { %v2161_v53 = vperm.slane %v2159_v34, 0 }
 0x162   :  { %2315 = vmatpush.bf16.msra.mxu3 %v3750_v33  ;;  %v2167_v59 = vunpack.c.l.bf16 %v2161_v53 }
 0x163   :  { %2330 = vmatpush.bf16.msra.mxu1 %v3756_v40 }
 0x166   :  { %2316 = vmatpush.bf16.msra.mxu3 %v3749_v38 }
 0x167   :  { %v1614_v1 = vpop.f32.mrf.mxu2 }
 0x168   :  { %v1615_v27 = vadd.f32 %v1614_v1, %v1602_v62 }
 0x16a   :  { %v1619_v35 = vpack.c.bf16 %v1615_v27, %v1524_v14  ;;  %2317 = vmatpush.bf16.msra.mxu3 %v3748_v50 }
 0x16c   :  { %v1641_v5 = vunpack.c.l.bf16 %v1619_v35  ;;  %v1642_v7 = vunpack.c.h.bf16 %v1619_v35 }
 0x16e   :  { %v1649_v60 = vadd.f32 %v1645_v2, %v1641_v5  ;;  %v1650_v55 = vadd.f32 %v1646_v3, %v1642_v7  ;;  %v3771_v7 = vld [vmem:[%s4082_s6] ss:$0 sm:$0xff]  ;;  %s3860_s6 = smov [#allocation7]  }
 0x16f   :  { %v1616_v8 = vpop.f32.mrf.mxu2  ;;  %s2367_s10 = sshll.u32 %s3860_s6, 4  ;;  %s2368_s10 = int_to_ptr.vmem [resolvable:$true] %s2367_s10 }
 0x170   :  { %v1659_v4 = vmax.f32 %v1649_v60, 0.0  ;;  %v1660_v9 = vmax.f32 %v1650_v55, 0.0 }
 0x172   :  { %v1663_v10 = vpack.c.bf16 %v1659_v4, %v1659_v4  ;;  %v1664_v11 = vpack.c.bf16 %v1660_v9, %v1660_v9 }
 0x174   :  { %2083 = vmatmul.bf16.vlgmr.msra.gmra.mxu2 %v1663_v10  ;;  %2096 = vmatmul.bf16.vlgmr.msra.gmra.mxu0 %v1664_v11 }
 0x184   :  { %2135 = vmatmul.bf16.vlgmr.msrb.gmra.mxu2 %v1663_v10  ;;  %2148 = vmatmul.bf16.vlgmr.msrb.gmra.mxu0 %v1664_v11 }
 0x186   :  { %v2071_v45 = vpop.f32.mrf.mxu1 }
 0x18b   :  { %v2058_v12 = vpop.f32.mrf.mxu3 }
 0x18c   :  { %v2072_v6 = vadd.f32 %v2071_v45, %v2058_v12 }
 0x18e   :  { %v2073_v13 = vpop.f32.mrf.mxu1 }
 0x193   :  { %v2060_v15 = vpop.f32.mrf.mxu3 }
 0x196   :  { %v2123_v16 = vpop.f32.mrf.mxu1 }
 0x19b   :  { %v2110_v37 = vpop.f32.mrf.mxu3 }
 0x19c   :  { %v2124_v17 = vadd.f32 %v2123_v16, %v2110_v37 }
 0x19e   :  { %v2125_v18 = vpop.f32.mrf.mxu1 }
 0x1a3   :  { %v2112_v19 = vpop.f32.mrf.mxu3 }
 0x1f1   :  { %v2097_v41 = vpop.f32.mrf.mxu0 }
 0x1f7   :  { %v2084_v51 = vpop.f32.mrf.mxu2 }
 0x1f8   :  { %v2085_v49 = vadd.f32 %v2084_v51, %v2072_v6 }
 0x1f9   :  { %v2099_v42 = vpop.f32.mrf.mxu0 }
 0x1fa   :  { %v2098_v25 = vadd.f32 %v2097_v41, %v2085_v49 }
 0x1ff   :  { %v2086_v43 = vpop.f32.mrf.mxu2 }
 0x201   :  { %v2149_v44 = vpop.f32.mrf.mxu0 }
 0x207   :  { %v2136_v30 = vpop.f32.mrf.mxu2 }
 0x208   :  { %v2137_v52 = vadd.f32 %v2136_v30, %v2124_v17 }
 0x209   :  { %v2151_v56 = vpop.f32.mrf.mxu0 }
 0x20a   :  { %v2150_v26 = vadd.f32 %v2149_v44, %v2137_v52 }
 0x20c   :  { %v2153_v58 = vpack.c.bf16 %v2150_v26, %v2098_v25 }
 0x20e   :  { %v2165_v62 = vunpack.c.l.bf16 %v2153_v58  ;;  %v2166_v63 = vunpack.c.h.bf16 %v2153_v58 }
 0x20f   :  { %v2138_v0 = vpop.f32.mrf.mxu2 }
 0x210   :  { %v2169_v1 = vadd.f32 %v2167_v59, %v2165_v62  ;;  %v2170_v14 = vadd.f32 %v2168_v61, %v2166_v63 }
 0x212   :  { %v2174_v27 = vmax.f32 %v2169_v1, 0.0  ;;  %v2175_v35 = vmax.f32 %v2170_v14, 0.0 }
 0x214   :  { %v2176_v2 = vpack.c.bf16 %v2174_v27, %v2174_v27  ;;  %v2177_v3 = vpack.c.bf16 %v2175_v35, %v2175_v35 }
 0x216   :  { %2318 = vmatmul.bf16.vlgmr.msra.gmra.mxu3 %v2176_v2  ;;  %2331 = vmatmul.bf16.vlgmr.msra.gmra.mxu1 %v2177_v3 }
 0x293   :  { %v2332_v5 = vpop.f32.mrf.mxu1 }
 0x299   :  { %v2319_v60 = vpop.f32.mrf.mxu3 }
 0x29a   :  { %v2320_v55 = vadd.f32 %v3771_v7, %v2319_v60 }
 0x29b   :  { %v2334_v8 = vpop.f32.mrf.mxu1 }
 0x29c   :  { %v2333_v4 = vadd.f32 %v2332_v5, %v2320_v55 }
 0x29e   :  { %v2337_v9 = vsel %vm2336_vm1, %v2333_v4, -inf }
 0x29f   :  { %2338 = vmax.xlane.f32.xlu0 %v2337_v9 }
 0x2a1   :  { %v2321_v10 = vpop.f32.mrf.mxu3 }
 0x312   :  { %v2339_v11 = vpop.xlane.xlu0 %2338 }
 0x313   :  { %v2340_v45 = vsub.f32 %v2333_v4, %v2339_v11 }
 0x315   :  { %v2341_v12 = vmul.f32 1.442695, %v2340_v45 }
 0x317   :  { %3772 = vpow2.f32 %v2341_v12 }
 0x31d   :  { %v3773_v6 = vpop.eup %3772 }
 0x31e   :  { %v2343_v13 = vsel %vm2336_vm1, %v3773_v6, 0.0 }
 0x31f   :  { %2344 = vadd.xlane.f32.xlu0 %v2343_v13 }
 0x392   :  { %v2345_v15 = vpop.xlane.xlu0 %2344 }
 0x393   :  { %3774 = vrcp.f32 %v2345_v15  ;;  %v2357_v18 = vand.u32 2147483648, %v2345_v15  ;;  %v2355_v20 = vand.u32 2147483647, %v2345_v15  ;;  %vm2351_vm3 = vweird.f32 %v2345_v15 }
 0x395   :  { %v2358_v22 = vor.u32 1.1754944e-38, %v2357_v18  ;;  %vm2356_vm5 = vcmp.eq.f32.partialorder %v2355_v20, 8.507059e+37 }
 0x399   :  { %v3775_v16 = vpop.eup %3774 }
 0x39a   :  { %v2347_v37 = vmul.f32 %v3775_v16, %v2345_v15  ;;  %vm2352_vm2 = vweird.f32 %v3775_v16 }
 0x39b   :  { %vm2353_vm4 = vmor %vm2351_vm3, %vm2352_vm2 }
 0x39c   :  { %v2348_v17 = vsub.f32 1.0, %v2347_v37 }
 0x39e   :  { %v2349_v19 = vmul.f32 %v3775_v16, %v2348_v17 }
 0x3a0   :  { %v2350_v21 = vadd.f32 %v3775_v16, %v2349_v19 }
 0x3a2   :  { %v2354_v23 = vsel %vm2353_vm4, %v3775_v16, %v2350_v21 }
 0x3a3   :  { %v2359_v24 = vsel %vm2356_vm5, %v2358_v22, %v2354_v23 }
 0x3a4   :  { %v2360_v46 = vmul.f32 %v3773_v6, %v2359_v24 }
 0x3a6   :  { %2361 = vst.msk [vmem:[#allocation7] sm:$0xff] %vm2336_vm1, %v2360_v46 }
 0x3a7   :  { %2372 = dma.vmem_to_hbm [thread:$0]  %s2368_s10, 128, %s2370_s13, [#allocation4]  }
 0x3a8   :  { %3852 = dma.done.wait [#allocation4], 128  }
 0x3a9   :  { %3853 = vsyncadd [#allocation4], 4294967168 }
 0x3aa   :  { %2377 = vsyncpa [#allocation3], 1 }
 0x3ab   :  { %2378 = vsyncpa [#allocation6], 1 }
 0x3ac   :  { %2379 = vsyncpa [#allocation4], 1 }

</bundles_post_ra>
